<compile_context>
chip_gen: v7x
topology: tpu7x:2x2x1
jax: 0.10.0
libtpu: 0.0.40
codegen_flags: <defaults>
</compile_context>

<pallas_src>
import functools

import numpy as np
import jax
import jax.numpy as jnp
from jax.experimental import pallas as pl
from jax.experimental.pallas import tpu as pltpu


_OFFSETS = tuple((dh, dw) for dh in (-1, 0, 1) for dw in (-1, 0, 1))


# ----------------------------- Pallas kernel ------------------------------- #

def _block_impl(x_ref, xs_ref, rc_ref, w1t_ref, w2st_ref, out_ref,
                taps1_ref, taps2_ref, *, cin, c, ho, wo, pimg,
                conv1_in_kernel):
    """Fused BasicBlock forward for `imgs` images (one grid step).

    x_ref:    (imgs, Cin, Pimg) bf16  raw image pixels (stride==1 path), or
              (imgs, 9*Cin, Pimg)     wrapper-built conv1 taps (stride>1 path)
    xs_ref:   (imgs, Cin, Pimg) bf16  shortcut pixels (== x_ref for stride==1)
    rc_ref:   (2, Pimg) int32         per-pixel (row, col) indices
    w1t_ref:  (C, 9*Cin) f32          conv1 weight, transposed + tap-packed
    w2st_ref: (C, 9*C + Cin) f32      conv2 weight with the 1x1 shortcut
                                      (or identity) fused as extra K columns
    out_ref:  (imgs, C, Pimg)
    taps1_ref:(9*Cin, imgs*Pimg) f32  VMEM scratch - conv1 taps
    taps2_ref:(9*C + Cin, imgs*Pimg)  VMEM scratch - conv2 taps + shortcut rows
    """
    f32 = jnp.float32
    imgs = out_ref.shape[0]

    # 9 per-position tap-validity masks (identical for every image), built
    # in-kernel from the tiny int32 row/col table.
    rc = rc_ref[...]
    row, col = rc[0:1], rc[1:2]                              # (1, Pimg) each
    masks = [((row + dh >= 0) & (row + dh < ho) &
              (col + dw >= 0) & (col + dw < wo)).astype(f32)
             for (dh, dw) in _OFFSETS]

    # ---- conv1 taps (and fused-shortcut operand) -> VMEM scratch ------------
    for j in range(imgs):
        lane = slice(j * pimg, (j + 1) * pimg)
        if conv1_in_kernel:
            # stride == 1: rebuild the 9 taps from the raw image with lane
            # rolls + masks (the 9x im2col never exists in HBM).
            xj = x_ref[j].astype(f32)                        # (Cin, Pimg)
            for t, (dh, dw) in enumerate(_OFFSETS):
                delta = dh * wo + dw
                sh = xj if delta == 0 else pltpu.roll(xj, (-delta) % pimg, axis=1)
                taps1_ref[t * cin:(t + 1) * cin, lane] = sh * masks[t]
        else:
            # stride > 1: taps were built (strided) in the wrapper.
            taps1_ref[:, lane] = x_ref[j].astype(f32)
        # Shortcut pixels live under the conv2 taps -> one fused matmul later.
        taps2_ref[9 * c:9 * c + cin, lane] = xs_ref[j].astype(f32)

    # ---- conv1 + ReLU: one wide MXU matmul, pixels on the lane dim ----------
    h1 = jnp.dot(w1t_ref[...], taps1_ref[...], preferred_element_type=f32)
    h1 = jnp.maximum(h1, 0.0)                                # (C, imgs*Pimg)

    # ---- conv2 taps: h1 never leaves VMEM, taps streamed into scratch -------
    for j in range(imgs):
        lane = slice(j * pimg, (j + 1) * pimg)
        hj = h1[:, lane]                                     # vreg-aligned slice
        for t, (dh, dw) in enumerate(_OFFSETS):
            delta = dh * wo + dw
            sh = hj if delta == 0 else pltpu.roll(hj, (-delta) % pimg, axis=1)
            taps2_ref[t * c:(t + 1) * c, lane] = sh * masks[t]

    # ---- conv2 + shortcut in ONE matmul (K = 9*C + Cin), then ReLU ----------
    acc = jnp.dot(w2st_ref[...], taps2_ref[...], preferred_element_type=f32)
    out = jnp.maximum(acc, 0.0)
    for j in range(imgs):
        out_ref[j] = out[:, j * pimg:(j + 1) * pimg].astype(out_ref.dtype)


def _kernel_stride1(x_ref, rc_ref, w1t_ref, w2st_ref, out_ref,
                    taps1_ref, taps2_ref, **kw):
    _block_impl(x_ref, x_ref, rc_ref, w1t_ref, w2st_ref, out_ref,
                taps1_ref, taps2_ref, conv1_in_kernel=True, **kw)


def _kernel_strided(x1t_ref, xs_ref, rc_ref, w1t_ref, w2st_ref, out_ref,
                    taps1_ref, taps2_ref, **kw):
    _block_impl(x1t_ref, xs_ref, rc_ref, w1t_ref, w2st_ref, out_ref,
                taps1_ref, taps2_ref, conv1_in_kernel=False, **kw)


# ------------------------------- JAX wrapper -------------------------------- #

def basic_block_forward(x_nchw, w1, w2, ws=None, stride=1,
                        x_dtype=jnp.bfloat16, out_dtype=jnp.float32,
                        target_lanes=2048):
    """BasicBlock.forward (use_batchnorm=False) via one fused Pallas TPU kernel.

    x_nchw: (N, Cin, H, W) f32 input (PyTorch layout)
    w1: (3,3,Cin,C) HWIO conv1 weight;  w2: (3,3,C,C) HWIO conv2 weight
    ws: (Cin, C) 1x1 shortcut weight, or None for the identity shortcut.
    """
    n, cin, h, w_sz = x_nchw.shape
    c = w1.shape[-1]
    ho = (h + 2 - 3) // stride + 1
    wo = (w_sz + 2 - 3) // stride + 1
    pimg = ho * wo
    x = x_nchw.astype(jnp.float32)

    # How many images share one grid step (folded into the lane dimension).
    imgs = max(1, min(n, target_lanes // pimg))
    if n >= 2:
        imgs = max(1, min(imgs, n // 2))   # keep >=2 parallel steps (v7x: 2 TCs)
    if pimg % 128:
        imgs = 1                           # keep in-kernel lane slices aligned
    while n % imgs:
        imgs -= 1
    grid = (n // imgs,)

    # Packed weights: every matmul is (Cout, K) @ (K, pixels).  The 1x1
    # shortcut (or an identity matrix for the identity shortcut) is appended
    # to the conv2 weight so the residual add rides the same MXU matmul.
    w1t = jnp.asarray(w1, jnp.float32).reshape(9 * cin, c).T        # (C, 9*Cin)
    w2p = jnp.asarray(w2, jnp.float32).reshape(9 * c, c).T          # (C, 9*C)
    if ws is None:
        assert stride == 1 and cin == c, "identity shortcut needs stride=1, Cin==C"
        ws_eff = jnp.eye(c, dtype=jnp.float32)
    else:
        ws_eff = jnp.asarray(ws, jnp.float32)                       # (Cin, C)
    w2st = jnp.concatenate([w2p, ws_eff.T], axis=1)                 # (C, 9*C+Cin)

    # Tiny int32 (row, col) table for the in-kernel tap-validity masks.
    rows = np.arange(pimg, dtype=np.int32) // wo
    cols = np.arange(pimg, dtype=np.int32) % wo
    rowcol = jnp.asarray(np.stack([rows, cols], axis=0))            # (2, Pimg)

    kw = dict(cin=cin, c=c, ho=ho, wo=wo, pimg=pimg)
    const_specs = [
        pl.BlockSpec((2, pimg), lambda i: (0, 0)),                  # rowcol
        pl.BlockSpec((c, 9 * cin), lambda i: (0, 0)),               # w1t
        pl.BlockSpec((c, 9 * c + cin), lambda i: (0, 0)),           # w2st (+ shortcut)
    ]
    if stride == 1:
        # Only the raw image crosses HBM; conv1 taps + shortcut operand are
        # rebuilt in-kernel from this single resident block.
        x_in = x.reshape(n, cin, pimg).astype(x_dtype)
        kernel = functools.partial(_kernel_stride1, **kw)
        in_specs = [pl.BlockSpec((imgs, cin, pimg), lambda i: (i, 0, 0))] + const_specs
        args = [x_in, rowcol, w1t, w2st]
    else:
        # TODO(synk): stride>1 keeps a wrapper-side strided im2col for conv1
        # (in-kernel roll-based im2col only covers stride==1).
        xp = jnp.pad(x, ((0, 0), (0, 0), (1, 1), (1, 1)))
        taps = [xp[:, :, di:di + (ho - 1) * stride + 1:stride,
                         dj:dj + (wo - 1) * stride + 1:stride]
                for di in range(3) for dj in range(3)]
        x1t = jnp.stack(taps, axis=1).reshape(n, 9 * cin, pimg).astype(x_dtype)
        xs = x[:, :, ::stride, ::stride].reshape(n, cin, pimg).astype(x_dtype)
        kernel = functools.partial(_kernel_strided, **kw)
        in_specs = [pl.BlockSpec((imgs, 9 * cin, pimg), lambda i: (i, 0, 0)),
                    pl.BlockSpec((imgs, cin, pimg), lambda i: (i, 0, 0))] + const_specs
        args = [x1t, xs, rowcol, w1t, w2st]

    flops = 2 * n * pimg * c * (9 * cin + 9 * c + cin)
    bytes_accessed = int(sum(a.size * a.dtype.itemsize for a in args)
                         + n * c * pimg * jnp.dtype(out_dtype).itemsize)

    out_flat = pl.pallas_call(
        kernel,
        out_shape=jax.ShapeDtypeStruct((n, c, pimg), out_dtype),
        grid_spec=pltpu.PrefetchScalarGridSpec(
            num_scalar_prefetch=0,
            grid=grid,
            in_specs=in_specs,
            out_specs=pl.BlockSpec((imgs, c, pimg), lambda i: (i, 0, 0)),
            scratch_shapes=[
                pltpu.VMEM((9 * cin, imgs * pimg), jnp.float32),       # conv1 taps
                pltpu.VMEM((9 * c + cin, imgs * pimg), jnp.float32),   # conv2 taps + shortcut
            ]),
        compiler_params=pltpu.CompilerParams(
            dimension_semantics=("parallel",),
            vmem_limit_bytes=32 * 1024 * 1024),
        cost_estimate=pl.CostEstimate(flops=flops, transcendentals=0,
                                      bytes_accessed=bytes_accessed),
    )(*args)

    # (N, C, Ho*Wo) is already NCHW order: just reshape, no transpose.
    return out_flat.reshape(n, c, ho, wo)


def reference_forward(x_nchw, w1, w2, ws=None, stride=1):
    """Pure-JAX/XLA reference, same semantics as the PyTorch module (f32)."""
    prec = jax.lax.Precision.HIGHEST
    x = jnp.transpose(x_nchw, (0, 2, 3, 1)).astype(jnp.float32)   # NCHW -> NHWC
    dn = jax.lax.conv_dimension_numbers(x.shape, w1.shape, ("NHWC", "HWIO", "NHWC"))
    h1 = jax.lax.conv_general_dilated(x, w1, (stride, stride), ((1, 1), (1, 1)),
                                      dimension_numbers=dn, precision=prec)
    h1 = jnp.maximum(h1, 0.0)
    h2 = jax.lax.conv_general_dilated(h1, w2, (1, 1), ((1, 1), (1, 1)),
                                      dimension_numbers=dn, precision=prec)
    xs = x[:, ::stride, ::stride, :]
    sc = xs if ws is None else jnp.einsum("nhwc,co->nhwo", xs, ws, precision=prec)
    return jnp.transpose(jnp.maximum(h2 + sc, 0.0), (0, 3, 1, 2))


# --------------------------------- main ------------------------------------- #

if __name__ == "__main__":
    def make_inputs(seed, n, in_planes, planes, stride, hw=16):
        kx, k1, k2, k3 = jax.random.split(jax.random.PRNGKey(seed), 4)
        x = jax.random.normal(kx, (n, in_planes, hw, hw), jnp.float32)
        w1 = jax.random.normal(k1, (3, 3, in_planes, planes), jnp.float32) \
            * (2.0 / (9 * in_planes)) ** 0.5
        w2 = jax.random.normal(k2, (3, 3, planes, planes), jnp.float32) \
            * (2.0 / (9 * planes)) ** 0.5
        if stride != 1 or in_planes != planes:   # module builds a 1x1 conv shortcut
            ws = jax.random.normal(k3, (in_planes, planes), jnp.float32) \
                * (2.0 / in_planes) ** 0.5
        else:
            ws = None                            # identity shortcut
        return x, w1, w2, ws

    def check(x, w1, w2, ws, stride):
        out = jax.block_until_ready(basic_block_forward(x, w1, w2, ws, stride=stride))
        ref = jax.block_until_ready(reference_forward(x, w1, w2, ws, stride=stride))
        assert out.shape == ref.shape, (out.shape, ref.shape)
        # Tolerance covers the bf16 activation cast (all accumulation is f32).
        np.testing.assert_allclose(np.asarray(out), np.asarray(ref),
                                   rtol=5e-2, atol=5e-2)
        return out

    # Primary config: BasicBlock(in_planes=4, planes=8, stride=1,
    # use_batchnorm=False) -> 1x1 conv shortcut.  Input x: (2, 4, 16, 16).
    x, w1, w2, ws = make_inputs(0, 2, 4, 8, 1)
    out = check(x, w1, w2, ws, stride=1)
    assert out.shape == (2, 8, 16, 16), out.shape

    # Identity-shortcut path (in_planes == planes, stride == 1).
    x, w1, w2, ws = make_inputs(1, 2, 8, 8, 1)
    check(x, w1, w2, ws, stride=1)

    # Larger batch: exercises batch-folded lane tiles (2 images per grid step).
    x, w1, w2, ws = make_inputs(2, 4, 4, 8, 1)
    check(x, w1, w2, ws, stride=1)

    # Downsampling block (stride=2 -> strided 1x1 conv shortcut), 32x32 input.
    x, w1, w2, ws = make_inputs(3, 2, 4, 8, 2, hw=32)
    out = check(x, w1, w2, ws, stride=2)
    assert out.shape == (2, 8, 16, 16), out.shape

    print("KERNEL_OK")
</pallas_src>

<mosaic_0001>
module attributes {stable_mosaic.version = 11 : i64} {
  func.func @_kernel_stride1(%arg0: i32, %arg1: memref<1x4x256xbf16, #tpu.memory_space<vmem>>, %arg2: memref<2x256xi32, #tpu.memory_space<vmem>>, %arg3: memref<8x36xf32, #tpu.memory_space<vmem>>, %arg4: memref<8x76xf32, #tpu.memory_space<vmem>>, %arg5: memref<1x8x256xf32, #tpu.memory_space<vmem>>, %arg6: memref<36x256xf32, #tpu.memory_space<vmem>>, %arg7: memref<76x256xf32, #tpu.memory_space<vmem>>) attributes {dimension_semantics = [#tpu.dimension_semantics<parallel>], iteration_bounds = array<i64: 2>, scalar_prefetch = 0 : i64, scratch_operands = 2 : i64, tpu.core_type = #tpu.core_type<tc>, window_params = [{transform_indices = @transform_0, window_bounds = array<i64: 1, 4, 256>}, {pipeline_mode = #tpu.pipeline_mode<synchronous>, transform_indices = @transform_1, window_bounds = array<i64: 2, 256>}, {pipeline_mode = #tpu.pipeline_mode<synchronous>, transform_indices = @transform_2, window_bounds = array<i64: 8, 36>}, {pipeline_mode = #tpu.pipeline_mode<synchronous>, transform_indices = @transform_3, window_bounds = array<i64: 8, 76>}, {transform_indices = @transform_4, window_bounds = array<i64: 1, 8, 256>}]} {
    %c0 = arith.constant 0 : index
    %c0_0 = arith.constant 0 : index
    %0 = vector.load %arg2[%c0, %c0_0] : memref<2x256xi32, #tpu.memory_space<vmem>>, vector<2x256xi32>
    %1 = vector.extract_strided_slice %0 {offsets = [0, 0], sizes = [1, 256], strides = [1, 1]} : vector<2x256xi32> to vector<1x256xi32>
    %2 = vector.extract_strided_slice %0 {offsets = [1, 0], sizes = [1, 256], strides = [1, 1]} : vector<2x256xi32> to vector<1x256xi32>
    %c-1_i32 = arith.constant -1 : i32
    %3 = vector.broadcast %c-1_i32 : i32 to vector<1x256xi32>
    %4 = arith.addi %1, %3 : vector<1x256xi32>
    %c0_i32 = arith.constant 0 : i32
    %5 = vector.broadcast %c0_i32 : i32 to vector<1x256xi32>
    %6 = arith.cmpi sge, %4, %5 : vector<1x256xi32>
    %c-1_i32_1 = arith.constant -1 : i32
    %7 = vector.broadcast %c-1_i32_1 : i32 to vector<1x256xi32>
    %8 = arith.addi %1, %7 : vector<1x256xi32>
    %c16_i32 = arith.constant 16 : i32
    %9 = vector.broadcast %c16_i32 : i32 to vector<1x256xi32>
    %10 = arith.cmpi slt, %8, %9 : vector<1x256xi32>
    %11 = arith.andi %6, %10 : vector<1x256xi1>
    %c-1_i32_2 = arith.constant -1 : i32
    %12 = vector.broadcast %c-1_i32_2 : i32 to vector<1x256xi32>
    %13 = arith.addi %2, %12 : vector<1x256xi32>
    %c0_i32_3 = arith.constant 0 : i32
    %14 = vector.broadcast %c0_i32_3 : i32 to vector<1x256xi32>
    %15 = arith.cmpi sge, %13, %14 : vector<1x256xi32>
    %16 = arith.andi %11, %15 : vector<1x256xi1>
    %c-1_i32_4 = arith.constant -1 : i32
    %17 = vector.broadcast %c-1_i32_4 : i32 to vector<1x256xi32>
    %18 = arith.addi %2, %17 : vector<1x256xi32>
    %c16_i32_5 = arith.constant 16 : i32
    %19 = vector.broadcast %c16_i32_5 : i32 to vector<1x256xi32>
    %20 = arith.cmpi slt, %18, %19 : vector<1x256xi32>
    %21 = arith.andi %16, %20 : vector<1x256xi1>
    %22 = arith.extui %21 : vector<1x256xi1> to vector<1x256xi32>
    %23 = arith.sitofp %22 : vector<1x256xi32> to vector<1x256xf32>
    %c-1_i32_6 = arith.constant -1 : i32
    %24 = vector.broadcast %c-1_i32_6 : i32 to vector<1x256xi32>
    %25 = arith.addi %1, %24 : vector<1x256xi32>
    %c0_i32_7 = arith.constant 0 : i32
    %26 = vector.broadcast %c0_i32_7 : i32 to vector<1x256xi32>
    %27 = arith.cmpi sge, %25, %26 : vector<1x256xi32>
    %c-1_i32_8 = arith.constant -1 : i32
    %28 = vector.broadcast %c-1_i32_8 : i32 to vector<1x256xi32>
    %29 = arith.addi %1, %28 : vector<1x256xi32>
    %c16_i32_9 = arith.constant 16 : i32
    %30 = vector.broadcast %c16_i32_9 : i32 to vector<1x256xi32>
    %31 = arith.cmpi slt, %29, %30 : vector<1x256xi32>
    %32 = arith.andi %27, %31 : vector<1x256xi1>
    %c0_i32_10 = arith.constant 0 : i32
    %33 = vector.broadcast %c0_i32_10 : i32 to vector<1x256xi32>
    %34 = arith.addi %2, %33 : vector<1x256xi32>
    %c0_i32_11 = arith.constant 0 : i32
    %35 = vector.broadcast %c0_i32_11 : i32 to vector<1x256xi32>
    %36 = arith.cmpi sge, %34, %35 : vector<1x256xi32>
    %37 = arith.andi %32, %36 : vector<1x256xi1>
    %c0_i32_12 = arith.constant 0 : i32
    %38 = vector.broadcast %c0_i32_12 : i32 to vector<1x256xi32>
    %39 = arith.addi %2, %38 : vector<1x256xi32>
    %c16_i32_13 = arith.constant 16 : i32
    %40 = vector.broadcast %c16_i32_13 : i32 to vector<1x256xi32>
    %41 = arith.cmpi slt, %39, %40 : vector<1x256xi32>
    %42 = arith.andi %37, %41 : vector<1x256xi1>
    %43 = arith.extui %42 : vector<1x256xi1> to vector<1x256xi32>
    %44 = arith.sitofp %43 : vector<1x256xi32> to vector<1x256xf32>
    %c-1_i32_14 = arith.constant -1 : i32
    %45 = vector.broadcast %c-1_i32_14 : i32 to vector<1x256xi32>
    %46 = arith.addi %1, %45 : vector<1x256xi32>
    %c0_i32_15 = arith.constant 0 : i32
    %47 = vector.broadcast %c0_i32_15 : i32 to vector<1x256xi32>
    %48 = arith.cmpi sge, %46, %47 : vector<1x256xi32>
    %c-1_i32_16 = arith.constant -1 : i32
    %49 = vector.broadcast %c-1_i32_16 : i32 to vector<1x256xi32>
    %50 = arith.addi %1, %49 : vector<1x256xi32>
    %c16_i32_17 = arith.constant 16 : i32
    %51 = vector.broadcast %c16_i32_17 : i32 to vector<1x256xi32>
    %52 = arith.cmpi slt, %50, %51 : vector<1x256xi32>
    %53 = arith.andi %48, %52 : vector<1x256xi1>
    %c1_i32 = arith.constant 1 : i32
    %54 = vector.broadcast %c1_i32 : i32 to vector<1x256xi32>
    %55 = arith.addi %2, %54 : vector<1x256xi32>
    %c0_i32_18 = arith.constant 0 : i32
    %56 = vector.broadcast %c0_i32_18 : i32 to vector<1x256xi32>
    %57 = arith.cmpi sge, %55, %56 : vector<1x256xi32>
    %58 = arith.andi %53, %57 : vector<1x256xi1>
    %c1_i32_19 = arith.constant 1 : i32
    %59 = vector.broadcast %c1_i32_19 : i32 to vector<1x256xi32>
    %60 = arith.addi %2, %59 : vector<1x256xi32>
    %c16_i32_20 = arith.constant 16 : i32
    %61 = vector.broadcast %c16_i32_20 : i32 to vector<1x256xi32>
    %62 = arith.cmpi slt, %60, %61 : vector<1x256xi32>
    %63 = arith.andi %58, %62 : vector<1x256xi1>
    %64 = arith.extui %63 : vector<1x256xi1> to vector<1x256xi32>
    %65 = arith.sitofp %64 : vector<1x256xi32> to vector<1x256xf32>
    %c0_i32_21 = arith.constant 0 : i32
    %66 = vector.broadcast %c0_i32_21 : i32 to vector<1x256xi32>
    %67 = arith.addi %1, %66 : vector<1x256xi32>
    %c0_i32_22 = arith.constant 0 : i32
    %68 = vector.broadcast %c0_i32_22 : i32 to vector<1x256xi32>
    %69 = arith.cmpi sge, %67, %68 : vector<1x256xi32>
    %c0_i32_23 = arith.constant 0 : i32
    %70 = vector.broadcast %c0_i32_23 : i32 to vector<1x256xi32>
    %71 = arith.addi %1, %70 : vector<1x256xi32>
    %c16_i32_24 = arith.constant 16 : i32
    %72 = vector.broadcast %c16_i32_24 : i32 to vector<1x256xi32>
    %73 = arith.cmpi slt, %71, %72 : vector<1x256xi32>
    %74 = arith.andi %69, %73 : vector<1x256xi1>
    %c-1_i32_25 = arith.constant -1 : i32
    %75 = vector.broadcast %c-1_i32_25 : i32 to vector<1x256xi32>
    %76 = arith.addi %2, %75 : vector<1x256xi32>
    %c0_i32_26 = arith.constant 0 : i32
    %77 = vector.broadcast %c0_i32_26 : i32 to vector<1x256xi32>
    %78 = arith.cmpi sge, %76, %77 : vector<1x256xi32>
    %79 = arith.andi %74, %78 : vector<1x256xi1>
    %c-1_i32_27 = arith.constant -1 : i32
    %80 = vector.broadcast %c-1_i32_27 : i32 to vector<1x256xi32>
    %81 = arith.addi %2, %80 : vector<1x256xi32>
    %c16_i32_28 = arith.constant 16 : i32
    %82 = vector.broadcast %c16_i32_28 : i32 to vector<1x256xi32>
    %83 = arith.cmpi slt, %81, %82 : vector<1x256xi32>
    %84 = arith.andi %79, %83 : vector<1x256xi1>
    %85 = arith.extui %84 : vector<1x256xi1> to vector<1x256xi32>
    %86 = arith.sitofp %85 : vector<1x256xi32> to vector<1x256xf32>
    %c0_i32_29 = arith.constant 0 : i32
    %87 = vector.broadcast %c0_i32_29 : i32 to vector<1x256xi32>
    %88 = arith.addi %1, %87 : vector<1x256xi32>
    %c0_i32_30 = arith.constant 0 : i32
    %89 = vector.broadcast %c0_i32_30 : i32 to vector<1x256xi32>
    %90 = arith.cmpi sge, %88, %89 : vector<1x256xi32>
    %c0_i32_31 = arith.constant 0 : i32
    %91 = vector.broadcast %c0_i32_31 : i32 to vector<1x256xi32>
    %92 = arith.addi %1, %91 : vector<1x256xi32>
    %c16_i32_32 = arith.constant 16 : i32
    %93 = vector.broadcast %c16_i32_32 : i32 to vector<1x256xi32>
    %94 = arith.cmpi slt, %92, %93 : vector<1x256xi32>
    %95 = arith.andi %90, %94 : vector<1x256xi1>
    %c0_i32_33 = arith.constant 0 : i32
    %96 = vector.broadcast %c0_i32_33 : i32 to vector<1x256xi32>
    %97 = arith.addi %2, %96 : vector<1x256xi32>
    %c0_i32_34 = arith.constant 0 : i32
    %98 = vector.broadcast %c0_i32_34 : i32 to vector<1x256xi32>
    %99 = arith.cmpi sge, %97, %98 : vector<1x256xi32>
    %100 = arith.andi %95, %99 : vector<1x256xi1>
    %c0_i32_35 = arith.constant 0 : i32
    %101 = vector.broadcast %c0_i32_35 : i32 to vector<1x256xi32>
    %102 = arith.addi %2, %101 : vector<1x256xi32>
    %c16_i32_36 = arith.constant 16 : i32
    %103 = vector.broadcast %c16_i32_36 : i32 to vector<1x256xi32>
    %104 = arith.cmpi slt, %102, %103 : vector<1x256xi32>
    %105 = arith.andi %100, %104 : vector<1x256xi1>
    %106 = arith.extui %105 : vector<1x256xi1> to vector<1x256xi32>
    %107 = arith.sitofp %106 : vector<1x256xi32> to vector<1x256xf32>
    %c0_i32_37 = arith.constant 0 : i32
    %108 = vector.broadcast %c0_i32_37 : i32 to vector<1x256xi32>
    %109 = arith.addi %1, %108 : vector<1x256xi32>
    %c0_i32_38 = arith.constant 0 : i32
    %110 = vector.broadcast %c0_i32_38 : i32 to vector<1x256xi32>
    %111 = arith.cmpi sge, %109, %110 : vector<1x256xi32>
    %c0_i32_39 = arith.constant 0 : i32
    %112 = vector.broadcast %c0_i32_39 : i32 to vector<1x256xi32>
    %113 = arith.addi %1, %112 : vector<1x256xi32>
    %c16_i32_40 = arith.constant 16 : i32
    %114 = vector.broadcast %c16_i32_40 : i32 to vector<1x256xi32>
    %115 = arith.cmpi slt, %113, %114 : vector<1x256xi32>
    %116 = arith.andi %111, %115 : vector<1x256xi1>
    %c1_i32_41 = arith.constant 1 : i32
    %117 = vector.broadcast %c1_i32_41 : i32 to vector<1x256xi32>
    %118 = arith.addi %2, %117 : vector<1x256xi32>
    %c0_i32_42 = arith.constant 0 : i32
    %119 = vector.broadcast %c0_i32_42 : i32 to vector<1x256xi32>
    %120 = arith.cmpi sge, %118, %119 : vector<1x256xi32>
    %121 = arith.andi %116, %120 : vector<1x256xi1>
    %c1_i32_43 = arith.constant 1 : i32
    %122 = vector.broadcast %c1_i32_43 : i32 to vector<1x256xi32>
    %123 = arith.addi %2, %122 : vector<1x256xi32>
    %c16_i32_44 = arith.constant 16 : i32
    %124 = vector.broadcast %c16_i32_44 : i32 to vector<1x256xi32>
    %125 = arith.cmpi slt, %123, %124 : vector<1x256xi32>
    %126 = arith.andi %121, %125 : vector<1x256xi1>
    %127 = arith.extui %126 : vector<1x256xi1> to vector<1x256xi32>
    %128 = arith.sitofp %127 : vector<1x256xi32> to vector<1x256xf32>
    %c1_i32_45 = arith.constant 1 : i32
    %129 = vector.broadcast %c1_i32_45 : i32 to vector<1x256xi32>
    %130 = arith.addi %1, %129 : vector<1x256xi32>
    %c0_i32_46 = arith.constant 0 : i32
    %131 = vector.broadcast %c0_i32_46 : i32 to vector<1x256xi32>
    %132 = arith.cmpi sge, %130, %131 : vector<1x256xi32>
    %c1_i32_47 = arith.constant 1 : i32
    %133 = vector.broadcast %c1_i32_47 : i32 to vector<1x256xi32>
    %134 = arith.addi %1, %133 : vector<1x256xi32>
    %c16_i32_48 = arith.constant 16 : i32
    %135 = vector.broadcast %c16_i32_48 : i32 to vector<1x256xi32>
    %136 = arith.cmpi slt, %134, %135 : vector<1x256xi32>
    %137 = arith.andi %132, %136 : vector<1x256xi1>
    %c-1_i32_49 = arith.constant -1 : i32
    %138 = vector.broadcast %c-1_i32_49 : i32 to vector<1x256xi32>
    %139 = arith.addi %2, %138 : vector<1x256xi32>
    %c0_i32_50 = arith.constant 0 : i32
    %140 = vector.broadcast %c0_i32_50 : i32 to vector<1x256xi32>
    %141 = arith.cmpi sge, %139, %140 : vector<1x256xi32>
    %142 = arith.andi %137, %141 : vector<1x256xi1>
    %c-1_i32_51 = arith.constant -1 : i32
    %143 = vector.broadcast %c-1_i32_51 : i32 to vector<1x256xi32>
    %144 = arith.addi %2, %143 : vector<1x256xi32>
    %c16_i32_52 = arith.constant 16 : i32
    %145 = vector.broadcast %c16_i32_52 : i32 to vector<1x256xi32>
    %146 = arith.cmpi slt, %144, %145 : vector<1x256xi32>
    %147 = arith.andi %142, %146 : vector<1x256xi1>
    %148 = arith.extui %147 : vector<1x256xi1> to vector<1x256xi32>
    %149 = arith.sitofp %148 : vector<1x256xi32> to vector<1x256xf32>
    %c1_i32_53 = arith.constant 1 : i32
    %150 = vector.broadcast %c1_i32_53 : i32 to vector<1x256xi32>
    %151 = arith.addi %1, %150 : vector<1x256xi32>
    %c0_i32_54 = arith.constant 0 : i32
    %152 = vector.broadcast %c0_i32_54 : i32 to vector<1x256xi32>
    %153 = arith.cmpi sge, %151, %152 : vector<1x256xi32>
    %c1_i32_55 = arith.constant 1 : i32
    %154 = vector.broadcast %c1_i32_55 : i32 to vector<1x256xi32>
    %155 = arith.addi %1, %154 : vector<1x256xi32>
    %c16_i32_56 = arith.constant 16 : i32
    %156 = vector.broadcast %c16_i32_56 : i32 to vector<1x256xi32>
    %157 = arith.cmpi slt, %155, %156 : vector<1x256xi32>
    %158 = arith.andi %153, %157 : vector<1x256xi1>
    %c0_i32_57 = arith.constant 0 : i32
    %159 = vector.broadcast %c0_i32_57 : i32 to vector<1x256xi32>
    %160 = arith.addi %2, %159 : vector<1x256xi32>
    %c0_i32_58 = arith.constant 0 : i32
    %161 = vector.broadcast %c0_i32_58 : i32 to vector<1x256xi32>
    %162 = arith.cmpi sge, %160, %161 : vector<1x256xi32>
    %163 = arith.andi %158, %162 : vector<1x256xi1>
    %c0_i32_59 = arith.constant 0 : i32
    %164 = vector.broadcast %c0_i32_59 : i32 to vector<1x256xi32>
    %165 = arith.addi %2, %164 : vector<1x256xi32>
    %c16_i32_60 = arith.constant 16 : i32
    %166 = vector.broadcast %c16_i32_60 : i32 to vector<1x256xi32>
    %167 = arith.cmpi slt, %165, %166 : vector<1x256xi32>
    %168 = arith.andi %163, %167 : vector<1x256xi1>
    %169 = arith.extui %168 : vector<1x256xi1> to vector<1x256xi32>
    %170 = arith.sitofp %169 : vector<1x256xi32> to vector<1x256xf32>
    %c1_i32_61 = arith.constant 1 : i32
    %171 = vector.broadcast %c1_i32_61 : i32 to vector<1x256xi32>
    %172 = arith.addi %1, %171 : vector<1x256xi32>
    %c0_i32_62 = arith.constant 0 : i32
    %173 = vector.broadcast %c0_i32_62 : i32 to vector<1x256xi32>
    %174 = arith.cmpi sge, %172, %173 : vector<1x256xi32>
    %c1_i32_63 = arith.constant 1 : i32
    %175 = vector.broadcast %c1_i32_63 : i32 to vector<1x256xi32>
    %176 = arith.addi %1, %175 : vector<1x256xi32>
    %c16_i32_64 = arith.constant 16 : i32
    %177 = vector.broadcast %c16_i32_64 : i32 to vector<1x256xi32>
    %178 = arith.cmpi slt, %176, %177 : vector<1x256xi32>
    %179 = arith.andi %174, %178 : vector<1x256xi1>
    %c1_i32_65 = arith.constant 1 : i32
    %180 = vector.broadcast %c1_i32_65 : i32 to vector<1x256xi32>
    %181 = arith.addi %2, %180 : vector<1x256xi32>
    %c0_i32_66 = arith.constant 0 : i32
    %182 = vector.broadcast %c0_i32_66 : i32 to vector<1x256xi32>
    %183 = arith.cmpi sge, %181, %182 : vector<1x256xi32>
    %184 = arith.andi %179, %183 : vector<1x256xi1>
    %c1_i32_67 = arith.constant 1 : i32
    %185 = vector.broadcast %c1_i32_67 : i32 to vector<1x256xi32>
    %186 = arith.addi %2, %185 : vector<1x256xi32>
    %c16_i32_68 = arith.constant 16 : i32
    %187 = vector.broadcast %c16_i32_68 : i32 to vector<1x256xi32>
    %188 = arith.cmpi slt, %186, %187 : vector<1x256xi32>
    %189 = arith.andi %184, %188 : vector<1x256xi1>
    %190 = arith.extui %189 : vector<1x256xi1> to vector<1x256xi32>
    %191 = arith.sitofp %190 : vector<1x256xi32> to vector<1x256xf32>
    %c0_69 = arith.constant 0 : index
    %c0_70 = arith.constant 0 : index
    %c0_71 = arith.constant 0 : index
    %192 = vector.load %arg1[%c0_69, %c0_70, %c0_71] : memref<1x4x256xbf16, #tpu.memory_space<vmem>>, vector<1x4x256xbf16>
    %193 = vector.shape_cast %192 : vector<1x4x256xbf16> to vector<4x256xbf16>
    %194 = arith.extf %193 : vector<4x256xbf16> to vector<4x256xf32>
    %c17_i32 = arith.constant 17 : i32
    %195 = tpu.dynamic_rotate %194 by %c17_i32 dim 1 : vector<4x256xf32>, i32 -> vector<4x256xf32>
    %196 = vector.broadcast %23 : vector<1x256xf32> to vector<4x256xf32>
    %197 = arith.mulf %195, %196 : vector<4x256xf32>
    %c0_72 = arith.constant 0 : index
    %c0_73 = arith.constant 0 : index
    %198 = vector.load %arg6[%c0_72, %c0_73] : memref<36x256xf32, #tpu.memory_space<vmem>>, vector<4x256xf32>
    tpu.vector_store %arg6[%c0_72, %c0_73], %197 {strides = array<i32>} : memref<36x256xf32, #tpu.memory_space<vmem>>, vector<4x256xf32>,
    %c16_i32_74 = arith.constant 16 : i32
    %199 = tpu.dynamic_rotate %194 by %c16_i32_74 dim 1 : vector<4x256xf32>, i32 -> vector<4x256xf32>
    %200 = vector.broadcast %44 : vector<1x256xf32> to vector<4x256xf32>
    %201 = arith.mulf %199, %200 : vector<4x256xf32>
    %c4 = arith.constant 4 : index
    %c0_75 = arith.constant 0 : index
    %202 = vector.load %arg6[%c4, %c0_75] : memref<36x256xf32, #tpu.memory_space<vmem>>, vector<4x256xf32>
    tpu.vector_store %arg6[%c4, %c0_75], %201 {strides = array<i32>} : memref<36x256xf32, #tpu.memory_space<vmem>>, vector<4x256xf32>,
    %c15_i32 = arith.constant 15 : i32
    %203 = tpu.dynamic_rotate %194 by %c15_i32 dim 1 : vector<4x256xf32>, i32 -> vector<4x256xf32>
    %204 = vector.broadcast %65 : vector<1x256xf32> to vector<4x256xf32>
    %205 = arith.mulf %203, %204 : vector<4x256xf32>
    %c8 = arith.constant 8 : index
    %c0_76 = arith.constant 0 : index
    %206 = vector.load %arg6[%c8, %c0_76] : memref<36x256xf32, #tpu.memory_space<vmem>>, vector<4x256xf32>
    tpu.vector_store %arg6[%c8, %c0_76], %205 {strides = array<i32>} : memref<36x256xf32, #tpu.memory_space<vmem>>, vector<4x256xf32>,
    %c1_i32_77 = arith.constant 1 : i32
    %207 = tpu.dynamic_rotate %194 by %c1_i32_77 dim 1 : vector<4x256xf32>, i32 -> vector<4x256xf32>
    %208 = vector.broadcast %86 : vector<1x256xf32> to vector<4x256xf32>
    %209 = arith.mulf %207, %208 : vector<4x256xf32>
    %c12 = arith.constant 12 : index
    %c0_78 = arith.constant 0 : index
    %210 = vector.load %arg6[%c12, %c0_78] : memref<36x256xf32, #tpu.memory_space<vmem>>, vector<4x256xf32>
    tpu.vector_store %arg6[%c12, %c0_78], %209 {strides = array<i32>} : memref<36x256xf32, #tpu.memory_space<vmem>>, vector<4x256xf32>,
    %211 = vector.broadcast %107 : vector<1x256xf32> to vector<4x256xf32>
    %212 = arith.mulf %194, %211 : vector<4x256xf32>
    %c16 = arith.constant 16 : index
    %c0_79 = arith.constant 0 : index
    %213 = vector.load %arg6[%c16, %c0_79] : memref<36x256xf32, #tpu.memory_space<vmem>>, vector<4x256xf32>
    tpu.vector_store %arg6[%c16, %c0_79], %212 {strides = array<i32>} : memref<36x256xf32, #tpu.memory_space<vmem>>, vector<4x256xf32>,
    %c255_i32 = arith.constant 255 : i32
    %214 = tpu.dynamic_rotate %194 by %c255_i32 dim 1 : vector<4x256xf32>, i32 -> vector<4x256xf32>
    %215 = vector.broadcast %128 : vector<1x256xf32> to vector<4x256xf32>
    %216 = arith.mulf %214, %215 : vector<4x256xf32>
    %c20 = arith.constant 20 : index
    %c0_80 = arith.constant 0 : index
    %217 = vector.load %arg6[%c20, %c0_80] : memref<36x256xf32, #tpu.memory_space<vmem>>, vector<4x256xf32>
    tpu.vector_store %arg6[%c20, %c0_80], %216 {strides = array<i32>} : memref<36x256xf32, #tpu.memory_space<vmem>>, vector<4x256xf32>,
    %c241_i32 = arith.constant 241 : i32
    %218 = tpu.dynamic_rotate %194 by %c241_i32 dim 1 : vector<4x256xf32>, i32 -> vector<4x256xf32>
    %219 = vector.broadcast %149 : vector<1x256xf32> to vector<4x256xf32>
    %220 = arith.mulf %218, %219 : vector<4x256xf32>
    %c24 = arith.constant 24 : index
    %c0_81 = arith.constant 0 : index
    %221 = vector.load %arg6[%c24, %c0_81] : memref<36x256xf32, #tpu.memory_space<vmem>>, vector<4x256xf32>
    tpu.vector_store %arg6[%c24, %c0_81], %220 {strides = array<i32>} : memref<36x256xf32, #tpu.memory_space<vmem>>, vector<4x256xf32>,
    %c240_i32 = arith.constant 240 : i32
    %222 = tpu.dynamic_rotate %194 by %c240_i32 dim 1 : vector<4x256xf32>, i32 -> vector<4x256xf32>
    %223 = vector.broadcast %170 : vector<1x256xf32> to vector<4x256xf32>
    %224 = arith.mulf %222, %223 : vector<4x256xf32>
    %c28 = arith.constant 28 : index
    %c0_82 = arith.constant 0 : index
    %225 = vector.load %arg6[%c28, %c0_82] : memref<36x256xf32, #tpu.memory_space<vmem>>, vector<4x256xf32>
    tpu.vector_store %arg6[%c28, %c0_82], %224 {strides = array<i32>} : memref<36x256xf32, #tpu.memory_space<vmem>>, vector<4x256xf32>,
    %c239_i32 = arith.constant 239 : i32
    %226 = tpu.dynamic_rotate %194 by %c239_i32 dim 1 : vector<4x256xf32>, i32 -> vector<4x256xf32>
    %227 = vector.broadcast %191 : vector<1x256xf32> to vector<4x256xf32>
    %228 = arith.mulf %226, %227 : vector<4x256xf32>
    %c32 = arith.constant 32 : index
    %c0_83 = arith.constant 0 : index
    %229 = vector.load %arg6[%c32, %c0_83] : memref<36x256xf32, #tpu.memory_space<vmem>>, vector<4x256xf32>
    tpu.vector_store %arg6[%c32, %c0_83], %228 {strides = array<i32>} : memref<36x256xf32, #tpu.memory_space<vmem>>, vector<4x256xf32>,
    %c0_84 = arith.constant 0 : index
    %c0_85 = arith.constant 0 : index
    %c0_86 = arith.constant 0 : index
    %230 = vector.load %arg1[%c0_84, %c0_85, %c0_86] : memref<1x4x256xbf16, #tpu.memory_space<vmem>>, vector<1x4x256xbf16>
    %231 = vector.shape_cast %230 : vector<1x4x256xbf16> to vector<4x256xbf16>
    %232 = arith.extf %231 : vector<4x256xbf16> to vector<4x256xf32>
    %c72 = arith.constant 72 : index
    %c0_87 = arith.constant 0 : index
    %233 = vector.load %arg7[%c72, %c0_87] : memref<76x256xf32, #tpu.memory_space<vmem>>, vector<4x256xf32>
    tpu.vector_store %arg7[%c72, %c0_87], %232 {strides = array<i32>} : memref<76x256xf32, #tpu.memory_space<vmem>>, vector<4x256xf32>,
    %c0_88 = arith.constant 0 : index
    %c0_89 = arith.constant 0 : index
    %234 = vector.load %arg3[%c0_88, %c0_89] : memref<8x36xf32, #tpu.memory_space<vmem>>, vector<8x36xf32>
    %c0_90 = arith.constant 0 : index
    %c0_91 = arith.constant 0 : index
    %235 = vector.load %arg6[%c0_90, %c0_91] : memref<36x256xf32, #tpu.memory_space<vmem>>, vector<36x256xf32>
    %cst = arith.constant dense<0.000000e+00> : vector<8x256xf32>
    %236 = tpu.matmul %234, %235, %cst {dimension_numbers = #tpu.dot_dimension_numbers<[1], [0], [0], [1], [0, 0, 1, 1], [], []>} : vector<8x36xf32>, vector<36x256xf32>, vector<8x256xf32> -> vector<8x256xf32>
    %cst_92 = arith.constant 0.000000e+00 : f32
    %237 = vector.broadcast %cst_92 : f32 to vector<8x256xf32>
    %238 = arith.maximumf %236, %237 : vector<8x256xf32>
    %c17_i32_93 = arith.constant 17 : i32
    %239 = tpu.dynamic_rotate %238 by %c17_i32_93 dim 1 : vector<8x256xf32>, i32 -> vector<8x256xf32>
    %240 = vector.broadcast %23 : vector<1x256xf32> to vector<8x256xf32>
    %241 = arith.mulf %239, %240 : vector<8x256xf32>
    %c0_94 = arith.constant 0 : index
    %c0_95 = arith.constant 0 : index
    %242 = vector.load %arg7[%c0_94, %c0_95] : memref<76x256xf32, #tpu.memory_space<vmem>>, vector<8x256xf32>
    tpu.vector_store %arg7[%c0_94, %c0_95], %241 {strides = array<i32>} : memref<76x256xf32, #tpu.memory_space<vmem>>, vector<8x256xf32>,
    %c16_i32_96 = arith.constant 16 : i32
    %243 = tpu.dynamic_rotate %238 by %c16_i32_96 dim 1 : vector<8x256xf32>, i32 -> vector<8x256xf32>
    %244 = vector.broadcast %44 : vector<1x256xf32> to vector<8x256xf32>
    %245 = arith.mulf %243, %244 : vector<8x256xf32>
    %c8_97 = arith.constant 8 : index
    %c0_98 = arith.constant 0 : index
    %246 = vector.load %arg7[%c8_97, %c0_98] : memref<76x256xf32, #tpu.memory_space<vmem>>, vector<8x256xf32>
    tpu.vector_store %arg7[%c8_97, %c0_98], %245 {strides = array<i32>} : memref<76x256xf32, #tpu.memory_space<vmem>>, vector<8x256xf32>,
    %c15_i32_99 = arith.constant 15 : i32
    %247 = tpu.dynamic_rotate %238 by %c15_i32_99 dim 1 : vector<8x256xf32>, i32 -> vector<8x256xf32>
    %248 = vector.broadcast %65 : vector<1x256xf32> to vector<8x256xf32>
    %249 = arith.mulf %247, %248 : vector<8x256xf32>
    %c16_100 = arith.constant 16 : index
    %c0_101 = arith.constant 0 : index
    %250 = vector.load %arg7[%c16_100, %c0_101] : memref<76x256xf32, #tpu.memory_space<vmem>>, vector<8x256xf32>
    tpu.vector_store %arg7[%c16_100, %c0_101], %249 {strides = array<i32>} : memref<76x256xf32, #tpu.memory_space<vmem>>, vector<8x256xf32>,
    %c1_i32_102 = arith.constant 1 : i32
    %251 = tpu.dynamic_rotate %238 by %c1_i32_102 dim 1 : vector<8x256xf32>, i32 -> vector<8x256xf32>
    %252 = vector.broadcast %86 : vector<1x256xf32> to vector<8x256xf32>
    %253 = arith.mulf %251, %252 : vector<8x256xf32>
    %c24_103 = arith.constant 24 : index
    %c0_104 = arith.constant 0 : index
    %254 = vector.load %arg7[%c24_103, %c0_104] : memref<76x256xf32, #tpu.memory_space<vmem>>, vector<8x256xf32>
    tpu.vector_store %arg7[%c24_103, %c0_104], %253 {strides = array<i32>} : memref<76x256xf32, #tpu.memory_space<vmem>>, vector<8x256xf32>,
    %255 = vector.broadcast %107 : vector<1x256xf32> to vector<8x256xf32>
    %256 = arith.mulf %238, %255 : vector<8x256xf32>
    %c32_105 = arith.constant 32 : index
    %c0_106 = arith.constant 0 : index
    %257 = vector.load %arg7[%c32_105, %c0_106] : memref<76x256xf32, #tpu.memory_space<vmem>>, vector<8x256xf32>
    tpu.vector_store %arg7[%c32_105, %c0_106], %256 {strides = array<i32>} : memref<76x256xf32, #tpu.memory_space<vmem>>, vector<8x256xf32>,
    %c255_i32_107 = arith.constant 255 : i32
    %258 = tpu.dynamic_rotate %238 by %c255_i32_107 dim 1 : vector<8x256xf32>, i32 -> vector<8x256xf32>
    %259 = vector.broadcast %128 : vector<1x256xf32> to vector<8x256xf32>
    %260 = arith.mulf %258, %259 : vector<8x256xf32>
    %c40 = arith.constant 40 : index
    %c0_108 = arith.constant 0 : index
    %261 = vector.load %arg7[%c40, %c0_108] : memref<76x256xf32, #tpu.memory_space<vmem>>, vector<8x256xf32>
    tpu.vector_store %arg7[%c40, %c0_108], %260 {strides = array<i32>} : memref<76x256xf32, #tpu.memory_space<vmem>>, vector<8x256xf32>,
    %c241_i32_109 = arith.constant 241 : i32
    %262 = tpu.dynamic_rotate %238 by %c241_i32_109 dim 1 : vector<8x256xf32>, i32 -> vector<8x256xf32>
    %263 = vector.broadcast %149 : vector<1x256xf32> to vector<8x256xf32>
    %264 = arith.mulf %262, %263 : vector<8x256xf32>
    %c48 = arith.constant 48 : index
    %c0_110 = arith.constant 0 : index
    %265 = vector.load %arg7[%c48, %c0_110] : memref<76x256xf32, #tpu.memory_space<vmem>>, vector<8x256xf32>
    tpu.vector_store %arg7[%c48, %c0_110], %264 {strides = array<i32>} : memref<76x256xf32, #tpu.memory_space<vmem>>, vector<8x256xf32>,
    %c240_i32_111 = arith.constant 240 : i32
    %266 = tpu.dynamic_rotate %238 by %c240_i32_111 dim 1 : vector<8x256xf32>, i32 -> vector<8x256xf32>
    %267 = vector.broadcast %170 : vector<1x256xf32> to vector<8x256xf32>
    %268 = arith.mulf %266, %267 : vector<8x256xf32>
    %c56 = arith.constant 56 : index
    %c0_112 = arith.constant 0 : index
    %269 = vector.load %arg7[%c56, %c0_112] : memref<76x256xf32, #tpu.memory_space<vmem>>, vector<8x256xf32>
    tpu.vector_store %arg7[%c56, %c0_112], %268 {strides = array<i32>} : memref<76x256xf32, #tpu.memory_space<vmem>>, vector<8x256xf32>,
    %c239_i32_113 = arith.constant 239 : i32
    %270 = tpu.dynamic_rotate %238 by %c239_i32_113 dim 1 : vector<8x256xf32>, i32 -> vector<8x256xf32>
    %271 = vector.broadcast %191 : vector<1x256xf32> to vector<8x256xf32>
    %272 = arith.mulf %270, %271 : vector<8x256xf32>
    %c64 = arith.constant 64 : index
    %c0_114 = arith.constant 0 : index
    %273 = vector.load %arg7[%c64, %c0_114] : memref<76x256xf32, #tpu.memory_space<vmem>>, vector<8x256xf32>
    tpu.vector_store %arg7[%c64, %c0_114], %272 {strides = array<i32>} : memref<76x256xf32, #tpu.memory_space<vmem>>, vector<8x256xf32>,
    %c0_115 = arith.constant 0 : index
    %c0_116 = arith.constant 0 : index
    %274 = vector.load %arg4[%c0_115, %c0_116] : memref<8x76xf32, #tpu.memory_space<vmem>>, vector<8x76xf32>
    %c0_117 = arith.constant 0 : index
    %c0_118 = arith.constant 0 : index
    %275 = vector.load %arg7[%c0_117, %c0_118] : memref<76x256xf32, #tpu.memory_space<vmem>>, vector<76x256xf32>
    %cst_119 = arith.constant dense<0.000000e+00> : vector<8x256xf32>
    %276 = tpu.matmul %274, %275, %cst_119 {dimension_numbers = #tpu.dot_dimension_numbers<[1], [0], [0], [1], [0, 0, 1, 1], [], []>} : vector<8x76xf32>, vector<76x256xf32>, vector<8x256xf32> -> vector<8x256xf32>
    %cst_120 = arith.constant 0.000000e+00 : f32
    %277 = vector.broadcast %cst_120 : f32 to vector<8x256xf32>
    %278 = arith.maximumf %276, %277 : vector<8x256xf32>
    %c0_121 = arith.constant 0 : index
    %c0_122 = arith.constant 0 : index
    %c0_123 = arith.constant 0 : index
    %279 = vector.load %arg5[%c0_121, %c0_122, %c0_123] : memref<1x8x256xf32, #tpu.memory_space<vmem>>, vector<1x8x256xf32>
    %280 = vector.shape_cast %279 : vector<1x8x256xf32> to vector<8x256xf32>
    %281 = vector.shape_cast %278 : vector<8x256xf32> to vector<1x8x256xf32>
    tpu.vector_store %arg5[%c0_121, %c0_122, %c0_123], %281 {strides = array<i32>} : memref<1x8x256xf32, #tpu.memory_space<vmem>>, vector<1x8x256xf32>,
    return
  }
  func.func @transform_0(%arg0: i32) -> (i32, i32, i32) {
    %c0_i32 = arith.constant 0 : i32
    %c0_i32_0 = arith.constant 0 : i32
    %c0_i32_1 = arith.constant 0 : i32
    return %arg0, %c0_i32, %c0_i32_0 : i32, i32, i32
  }
  func.func @transform_1(%arg0: i32) -> (i32, i32) {
    %c0_i32 = arith.constant 0 : i32
    %c0_i32_0 = arith.constant 0 : i32
    %c0_i32_1 = arith.constant 0 : i32
    return %c0_i32, %c0_i32_0 : i32, i32
  }
  func.func @transform_2(%arg0: i32) -> (i32, i32) {
    %c0_i32 = arith.constant 0 : i32
    %c0_i32_0 = arith.constant 0 : i32
    %c0_i32_1 = arith.constant 0 : i32
    return %c0_i32, %c0_i32_0 : i32, i32
  }
  func.func @transform_3(%arg0: i32) -> (i32, i32) {
    %c0_i32 = arith.constant 0 : i32
    %c0_i32_0 = arith.constant 0 : i32
    %c0_i32_1 = arith.constant 0 : i32
    return %c0_i32, %c0_i32_0 : i32, i32
  }
  func.func @transform_4(%arg0: i32) -> (i32, i32, i32) {
    %c0_i32 = arith.constant 0 : i32
    %c0_i32_0 = arith.constant 0 : i32
    %c0_i32_1 = arith.constant 0 : i32
    return %arg0, %c0_i32, %c0_i32_0 : i32, i32, i32
  }
}

</mosaic_0001>

<bundles_post_ra>
// kernel: tpu_custom_call.1
= control target key start
LH: loop header
LB: loop body
LE: loop exit
PB: predicated region body
PF: predicated region fallthrough
CT: control target
= control target key end

     0   :  { %9 = vsyncpa [#allocation5], 0  ;;  %s1981_s0 = inlined_call_operand.hbm [shape: bf16[2,4,256], index: 0, kind: input, shape index: {}]   ;;  %s1982_s1 = inlined_call_operand.hbm [shape: s32[2,256], index: 1, kind: input, shape index: {}]   ;;  %s1983_s2 = inlined_call_operand.hbm [shape: f32[8,36], index: 2, kind: input, shape index: {}]   ;;  %s1984_s3 = inlined_call_operand.vmem [shape: f32[8,76], index: 3, kind: input, shape index: {}]   ;;  %s1985_s4 = inlined_call_operand.hbm [shape: f32[2,8,256], index: 4, kind: output, shape index: {}]  }
   0x1   :  { %11 = vsyncpa [#allocation5 + $0x1], 0 }
   0x2   :  { %12 = vsyncpa [#allocation8], 0 }
   0x3   :  { %13 = vsyncpa [#allocation6], 0 }
   0x4   :  { %15 = vsyncpa [#allocation6 + $0x1], 0  ;;  %s1394_s15 = smov 0   ;;  %s1396_s16 = smov 0  }
   0x5   :  { %s1398_s17 = smov 0   ;;  %s1400_s18 = smov 0  }
   0x6 LB: > { %s1415_s19 = sadd.s32 4294967295, %s1352_s18   ;;  %s1007_s20 = sadd.s32 4294967294, %s1352_s18   ;;  %s1352_s18 = sphi %s1400_s18, %s2023_s18   ;;  %s1348_s17 = sphi %s1398_s17, %s2022_s17   ;;  %s1344_s16 = sphi %s1396_s16, %s2021_s16   ;;  %s1340_s15 = sphi %s1394_s15, %s2020_s15  }
   0x7   : > { %p41_p0 = scmp.ne.s32.totalorder %s1344_s16, %s1340_s15  ;;  %p1986_p1 = scmp.eq.s32.totalorder %s1415_s19, 0 }
   0x8   : > { %p134_p3 = scmp.eq.s32.totalorder %s1007_s20, 1  ;;  %p1008_p5 = scmp.ge.s32.totalorder %s1352_s18, 1 }
   0x9   : > { %p1424_p4 = por %p1986_p1, %p41_p0  ;;  %p141_p7 = scmp.lt.s32.totalorder %s1352_s18, 3 }
   0xa   : > { %p1429_p6 = por %p134_p3, %p41_p0  ;;  %s1354_s24 = smov [#allocation7]  }
   0xb   : > { %s1989_s21 = scalar_select %p1424_p4, 1, 0 }
   0xc   : > { %s1990_s22 = scalar_select %p1429_p6, 1, 0 }
   0xd   : > { %p1434_p8 = pnand %p1008_p5, %p141_p7  ;;  %s154_s25 = sshll.u32 %s1354_s24, 4  ;;  %s155_s25 = int_to_ptr.vmem [resolvable:$true] %s154_s25 }
   0xe   : > { %s1355_s26 = smov [#allocation9]   ;;  %s1450_s29 = sadd.s32 1, %s1352_s18  }
   0xf   : > { %s1991_s23 = scalar_select %p1434_p8, 1, 0 }
  0x10   : > { %p1090_p10 = pneg %p1434_p8  ;;  %s165_s27 = sshll.u32 %s1355_s26, 4  ;;  %s1447_s27 = int_to_ptr.vmem [resolvable:$true] %s165_s27 }
  0x11   : > { %s25_s30 = ssub.s32 %s1352_s18, %s1450_s29  ;;  %s1196_s7 = scalar_lea.hbm %s1982_s1, 64 }
  0x12   : > { %p1443_p11 = pnand %p1090_p10, %p1986_p1  ;;  %p1197_p12 = scmp.ne.s32.totalorder %s1982_s1, %s1196_s7 }
  0x13   : > { %p1203_p5 = scmp.lt.u32.totalorder %s1196_s7, %s1982_s1 }
  0x14   : > { %p1198_p13 = pneg %p1443_p11 }
  0x16   : > { %p1199_p0 = pnand %p1198_p13, %p1197_p12 }
  0x18   : > { %p1200_p3 = pneg %p1199_p0 }
  0x1a   : > { %p1205_p7 = pnand %p1203_p5, %p1200_p3 }
  0x1c   : > { %1208 = shalt.err (!%p1205_p7)
}
  0x1d   : > { %s1209_s12 = scalar_lea.vmem %s155_s25, 64  ;;  %p1217_p2 = scmp.lt.s32.totalorder %s155_s25, %s155_s25 }
  0x1e   : > { %p1210_p10 = scmp.ne.s32.totalorder %s155_s25, %s1209_s12  ;;  %p1218_p6 = scmp.lt.s32.totalorder %s1209_s12, %s1209_s12 }
  0x20   : > { %p1212_p9 = pnand %p1210_p10, %p1198_p13  ;;  %p1219_p4 = por %p1218_p6, %p1217_p2 }
  0x22   : > { %p1213_p1 = pneg %p1212_p9 }
  0x24   : > { %p1220_p8 = pnand %p1219_p4, %p1213_p1 }
  0x26   : > { %1223 = shalt.err (!%p1220_p8)
}
  0x27   : > { %1093 = dma.hbm_to_vmem [thread:$0]  (!%p1443_p11), %s1982_s1, 64, %s155_s25, [#allocation8]  }
  0x28   : > { %s1224_s26 = scalar_lea.hbm %s1983_s2, 128 }
  0x29   : > { %p1225_p9 = scmp.ne.s32.totalorder %s1983_s2, %s1224_s26  ;;  %p1231_p4 = scmp.lt.u32.totalorder %s1224_s26, %s1983_s2 }
  0x2b   : > { %p1227_p2 = pnand %p1225_p9, %p1198_p13 }
  0x2d   : > { %p1228_p1 = pneg %p1227_p2 }
  0x2f   : > { %p1233_p6 = pnand %p1231_p4, %p1228_p1 }
  0x31   : > { %1236 = shalt.err (!%p1233_p6)
}
  0x32   : > { %s1237_s25 = scalar_lea.vmem %s1447_s27, 128  ;;  %p1245_p3 = scmp.lt.s32.totalorder %s1447_s27, %s1447_s27 }
  0x33   : > { %p1238_p8 = scmp.ne.s32.totalorder %s1447_s27, %s1237_s25  ;;  %p1246_p5 = scmp.lt.s32.totalorder %s1237_s25, %s1237_s25 }
  0x35   : > { %p1240_p12 = pnand %p1238_p8, %p1198_p13  ;;  %p1247_p7 = por %p1246_p5, %p1245_p3 }
  0x37   : > { %p1241_p0 = pneg %p1240_p12 }
  0x39   : > { %p1248_p10 = pnand %p1247_p7, %p1241_p0 }
  0x3b   : > { %1251 = shalt.err (!%p1248_p10)
}
  0x3c   : > { %1096 = dma.hbm_to_vmem [thread:$0]  (!%p1443_p11), %s1983_s2, 128, %s1447_s27, [#allocation8]  }
  0x3d   : > { %p26_p13 = scmp.eq.s32.totalorder %s25_s30, 0  ;;  %s28_s11 = sadd.s32 1, %s1348_s17 }
  0x3e   : > { %p35_p9 = scmp.ne.s32.totalorder %s1348_s17, %s1344_s16  ;;  %p36_p2 = scmp.eq.s32.totalorder %s1352_s18, 0 }
  0x3f   : > { %s1509_s28 = scalar_select %p26_p13, %s1348_s17, %s28_s11  }
  0x40   : > { %p37_p1 = por %p36_p2, %p35_p9  ;;  %p1993_p4 = scmp.eq.s32.totalorder %s1415_s19, 1 }
  0x41   : > { %p1107_p8 = scmp.lt.s32.totalorder %s1352_s18, 2  ;;  %s179_s13 = sand.u32 1, %s1348_s17  }
  0x42   : > { %p1513_p6 = por %p1993_p4, %p35_p9  ;;  %s1012_s14 = sshll.u32 %s179_s13, 2 }
  0x43   : > { %s1046_s20 = sshll.u32 %s1352_s18, 6  ;;  %s183_s30 = scalar_lea.vmem [#allocation4], %s1012_s14 }
  0x44   : > { %s1523_s27 = scalar_lea.hbm %s1981_s0, %s1046_s20  ;;  %s191_s5 = sshll.u32 %s183_s30, 4  ;;  %s1525_s5 = int_to_ptr.vmem [resolvable:$true] %s191_s5 }
  0x45   : > { %p1527_p11 = pnand %p1107_p8, %p37_p1  ;;  %s180_s7 = scalar_lea.sflag [#allocation5], %s179_s13 }
  0x46   : > { %s1252_s8 = scalar_lea.hbm %s1523_s27, 64  ;;  %s1257_s10 = scalar_lea.hbm %s1981_s0, 128 }
  0x47   : > { %p1253_p12 = scmp.ne.s32.totalorder %s1523_s27, %s1252_s8  ;;  %p1254_p0 = pneg %p1527_p11 }
  0x48   : > { %p1258_p7 = scmp.lt.u32.totalorder %s1523_s27, %s1981_s0  ;;  %p1259_p10 = scmp.lt.u32.totalorder %s1257_s10, %s1252_s8 }
  0x49   : > { %p1255_p3 = pnand %p1254_p0, %p1253_p12  ;;  %p1261_p9 = scmp.lt.u32.totalorder %s1252_s8, %s1523_s27 }
  0x4a   : > { %p1260_p13 = por %p1259_p10, %p1258_p7 }
  0x4b   : > { %p1256_p5 = pneg %p1255_p3 }
  0x4c   : > { %p1262_p2 = por %p1261_p9, %p1260_p13 }
  0x4e   : > { %p1263_p1 = pnand %p1262_p2, %p1256_p5 }
  0x50   : > { %1266 = shalt.err (!%p1263_p1)
}
  0x51   : > { %s1267_s13 = scalar_lea.vmem %s1525_s5, 64  ;;  %s1356_s20 = smov [#allocation4]  }
  0x52   : > { %p1268_p4 = scmp.ne.s32.totalorder %s1525_s5, %s1267_s13  ;;  %s1272_s24 = sshll.u32 %s1356_s20, 4  ;;  %s1273_s24 = int_to_ptr.vmem [resolvable:$false] %s1272_s24 }
  0x53   : > { %s1274_s26 = scalar_lea.vmem %s1273_s24, 128  ;;  %p1275_p3 = scmp.lt.s32.totalorder %s1525_s5, %s1273_s24 }
  0x54   : > { %p1270_p8 = pnand %p1268_p4, %p1254_p0  ;;  %p1276_p7 = scmp.lt.s32.totalorder %s1274_s26, %s1267_s13 }
  0x56   : > { %p1271_p12 = pneg %p1270_p8  ;;  %p1277_p10 = por %p1276_p7, %p1275_p3 }
  0x58   : > { %p1278_p13 = pnand %p1277_p10, %p1271_p12 }
  0x5a   : > { %1281 = shalt.err (!%p1278_p13)
}
  0x5b   : > { %1100 = dma.hbm_to_vmem [thread:$0]  (!%p1527_p11), %s1523_s27, 64, %s1525_s5, %s180_s7  }
  0x5c   : > { %p1996_p5 = scmp.ne.s32.totalorder %s1991_s23, 0 }
  0x5d   : > { %s1559_s30 = sand.u32 (!%p1996_p5), 1, %s1344_s16   ;;  %p1997_p0 = scmp.ne.s32.totalorder (!%p1996_p5), %s1989_s21, 0 }
  0x5e   : > { %200 = sbr.rel (%p1996_p5) target bundleno = 857 (0x359), region = 36  ;;  %s1016_s8 = sshll.u32 (!%p1996_p5), %s1559_s30, 2 }
  0x5f   : > { %s203_s25 = scalar_lea.sflag (!%p1996_p5), [#allocation5], %s1559_s30  ;;  %s1563_s9 = scalar_lea.vmem (!%p1996_p5), [#allocation4], %s1016_s8 }
  0x65   : > { %1327 = dma.done.wait (%p1997_p0), %s203_s25, 64  }
  0x66   : > { %1329 = vsyncadd (%p1997_p0), %s203_s25, 4294967232  ;;  %p1998_p11 = scmp.eq.s32.totalorder %s1415_s19, 0 }
  0x68   : > { %1331 = dma.done.wait (%p1998_p11), [#allocation8], 192   ;;  %p1999_p9 = pmov %p1998_p11 }
  0x69   : > { %v1357_v0 = vmov 0.0   ;;  %v320_v1 = vlaneseq  ;;  %v311_v2 = vld [vmem:[%s1563_s9] sm:$0xf]  ;;  %v239_v3 = vld [vmem:[#allocation7] sm:$0xf]  ;;  %v1358_v7 = vmov 0  }
  0x6a   : > { %1333 = vsyncadd (%p1999_p9), [#allocation8], 4294967104  ;;  %704 = vmatprep.mubr.f32.mxu0 %v1357_v0  ;;  %892 = vmatprep.mubr.f32.mxu1 %v1357_v0  ;;  %v1576_v4 = vunpack.c.l.bf16 %v311_v2  ;;  %v240_v5 = vadd.s32 4294967295, %v239_v3  ;;  %vm256_vm0 = vcmp.ge.s32.totalorder %v239_v3, 0  ;;  %vm262_vm1 = vcmp.lt.s32.totalorder %v239_v3, 16  ;;  %s1359_s21 = smov 16  }
  0x6b   : > { %v327_v6 = vshrl.u32 %v320_v1, 7  ;;  %v257_v8 = vsel %vm256_vm0, 1, %v1358_v7  ;;  %v263_v9 = vsel %vm262_vm1, 1, %v1358_v7  ;;  %v1581_v10 = vadd.s32 1, %v239_v3  ;;  %s1360_s23 = smov 17   ;;  %vm1611_vm8 = vmand %vm256_vm0, %vm262_vm1  ;;  %s1361_s27 = smov 1  }
  0x6c   : > { %v314_v11 = vcombine.high %v1576_v4, %v1576_v4  ;;  %vm241_vm2 = vcmp.ge.s32.totalorder %v240_v5, 0  ;;  %vm242_vm3 = vcmp.lt.s32.totalorder %v240_v5, 16  ;;  %v1023_v12 = vrot.slane %v257_v8, 9  ;;  %s1362_s5 = smov 15   ;;  %s1363_s6 = smov 127  }
  0x6d   : > { %v1024_v13 = vrot.slane %v263_v9, 9  ;;  %v244_v14 = vsel %vm241_vm2, 1, %v1358_v7  ;;  %v249_v15 = vsel %vm242_vm3, 1, %v1358_v7  ;;  %vm1588_vm4 = vmand %vm241_vm2, %vm242_vm3  ;;  %vm271_vm5 = vcmp.ge.s32.totalorder %v1581_v10, 0  ;;  %s1364_s7 = smov 112   ;;  %s1365_s10 = smov 113  }
  0x6e   : > { %v1586_v16 = vpack.i.bf16 %v314_v11, %v1576_v4  ;;  %v1593_v18 = vsub.s32 0, %v327_v6  ;;  %v1595_v19 = vsub.s32 2, %v327_v6  ;;  %vm1601_vm6 = vcmp.ne.s32.totalorder %v1023_v12, 0  ;;  %s1366_s11 = smov 111   ;;  %s1019_s20 = sshll.u32 %s1559_s30, 4 }
  0x6f   : > { %vm1605_vm7 = vcmp.ne.s32.totalorder %v1024_v13, 0  ;;  %v1020_v22 = vrot.slane %v244_v14, 9  ;;  %v1021_v23 = vrot.slane %v249_v15, 9  ;;  %vm261_vm9 = vmand %vm1588_vm4, %vm1601_vm6  ;;  %v272_v25 = vsel %vm271_vm5, 1, %v1358_v7  ;;  %s1047_s24 = sshll.u32 %s1415_s19, 8  ;;  %s238_s26 = scalar_lea.vmem [#allocation10], %s1019_s20 }
  0x70   : > { %1157 = vrot.lane.b32.xlu0 %v1586_v16, %s1359_s21  ;;  %1167 = vrot.lane.b32.xlu1 %v1586_v16, %s1360_s23  ;;  %vm277_vm10 = vcmp.lt.s32.totalorder %v1581_v10, 16  ;;  %vm267_vm11 = vmand %vm261_vm9, %vm1605_vm7  ;;  %v1026_v28 = vrot.slane %v272_v25, 9  ;;  %s918_s8 = sshll.u32 %s238_s26, 4  ;;  %s1939_s8 = int_to_ptr.vmem [resolvable:$true] %s918_s8 }
  0x71   : > { %vm1624_vm12 = vcmp.ne.s32.totalorder %v1020_v22, 0  ;;  %vm1628_vm13 = vcmp.ne.s32.totalorder %v1021_v23, 0  ;;  %v278_v29 = vsel %vm277_vm10, 1, %v1358_v7  ;;  %v1025_v30 = vsel %vm267_vm11, 1.0, %v1357_v0  ;;  %vm290_vm3 = vmand %vm1611_vm8, %vm1601_vm6  ;;  %s1282_s19 = scalar_lea.vmem %s1939_s8, 256 }
  0x72   : > { %vm248_vm14 = vmand %vm1588_vm4, %vm1624_vm12  ;;  %v1027_v31 = vrot.slane %v278_v29, 9  ;;  %v359_v32 = vrot.slane %v1025_v30, %v1593_v18  ;;  %v363_v33 = vrot.slane %v1025_v30, %v1595_v19  ;;  %vm1652_vm1 = vcmp.ne.s32.totalorder %v1026_v28, 0  ;;  %p1283_p2 = scmp.ne.s32.totalorder %s1939_s8, %s1282_s19 }
  0x73   : > { %vm253_vm15 = vmand %vm248_vm14, %vm1628_vm13  ;;  %v1795_v22 = vand.u32 127, %v320_v1 }
  0x74   : > { %1162 = vrot.lane.b32.xlu0 %v1586_v16, %s1361_s27  ;;  %1172 = vrot.lane.b32.xlu1 %v1586_v16, %s1362_s5  ;;  %v1022_v34 = vsel %vm253_vm15, 1.0, %v1357_v0  ;;  %vm286_vm0 = vmand %vm1611_vm8, %vm1624_vm12  ;;  %v1657_v36 = vrot.slane %v359_v32, %v1593_v18  ;;  %v1660_v37 = vrot.slane %v363_v33, %v1593_v18  ;;  %vm1671_vm9 = vcmp.ne.s32.totalorder %v1027_v31, 0  ;;  %p1284_p1 = pnand %p1283_p2, %p1513_p6 }
  0x75   : > { %v329_v38 = vrot.slane %v1022_v34, %v1593_v18  ;;  %v333_v39 = vrot.slane %v1022_v34, %v1595_v19  ;;  %vm287_vm2 = vmand %vm286_vm0, %vm1628_vm13 }
  0x76   : > { %v1029_v40 = vsel %vm287_vm2, 1.0, %v1357_v0  ;;  %vm291_vm11 = vmand %vm290_vm3, %vm1605_vm7  ;;  %vm418_vm3 = vcmp.lt.s32.totalorder %v1795_v22, 1  ;;  %p1285_p4 = pneg %p1284_p1 }
  0x77   : > { %v1680_v42 = vrot.slane %v329_v38, %v1593_v18  ;;  %v1683_v43 = vrot.slane %v333_v39, %v1593_v18  ;;  %v425_v44 = vrot.slane %v1029_v40, %v1593_v18  ;;  %v1030_v45 = vsel %vm291_vm11, 1.0, %v1357_v0  ;;  %vm276_vm14 = vmand %vm1588_vm4, %vm1652_vm1 }
  0x78   : > { %1177 = vrot.lane.b32.xlu0 %v1586_v16, %s1363_s6  ;;  %1182 = vrot.lane.b32.xlu1 %v1586_v16, %s1364_s7  ;;  %v429_v46 = vrot.slane %v1029_v40, %v1595_v19  ;;  %v454_v48 = vrot.slane %v1030_v45, %v1593_v18  ;;  %v458_v49 = vrot.slane %v1030_v45, %v1595_v19  ;;  %vm282_vm15 = vmand %vm276_vm14, %vm1671_vm9  ;;  %vm483_vm11 = vcmp.lt.s32.totalorder %v1795_v22, 127 }
  0x79   : > { %v1695_v47 = vrot.slane %v425_v44, %v1593_v18  ;;  %v1028_v51 = vsel %vm282_vm15, 1.0, %v1357_v0  ;;  %vm294_vm4 = vmand %vm1611_vm8, %vm1652_vm1  ;;  %vm549_vm14 = vcmp.lt.s32.totalorder %v1795_v22, 112  ;;  %vm519_vm15 = vcmp.lt.s32.totalorder %v1795_v22, 113 }
  0x7a   : > { %v1702_v50 = vrot.slane %v429_v46, %v1593_v18  ;;  %v1714_v52 = vrot.slane %v454_v48, %v1593_v18  ;;  %v1717_v53 = vrot.slane %v458_v49, %v1593_v18  ;;  %v395_v54 = vrot.slane %v1028_v51, %v1593_v18  ;;  %vm295_vm0 = vmand %vm294_vm4, %vm1671_vm9 }
  0x7b   : > { %v399_v55 = vrot.slane %v1028_v51, %v1595_v19  ;;  %v1031_v56 = vsel %vm295_vm0, 1.0, %v1357_v0  ;;  %vm1728_vm8 = vmand %vm271_vm5, %vm277_vm10  ;;  %vm585_vm4 = vcmp.lt.s32.totalorder %v1795_v22, 111  ;;  %vm633_vm0 = vcmask 1043456  }
  0x7c   : > { %1187 = vrot.lane.b32.xlu0 %v1586_v16, %s1365_s10  ;;  %1192 = vrot.lane.b32.xlu1 %v1586_v16, %s1366_s11  ;;  %v471_v58 = vcombine.low %v1714_v52, %v1717_v53  ;;  %v1735_v59 = vrot.slane %v395_v54, %v1593_v18  ;;  %v490_v60 = vrot.slane %v1031_v56, %v1593_v18  ;;  %vm303_vm2 = vmand %vm1728_vm8, %vm1601_vm6 }
  0x7d   : > { %v494_v61 = vrot.slane %v1031_v56, %v1595_v19  ;;  %v1744_v62 = vrot.slane %v399_v55, %v1593_v18  ;;  %vm304_vm5 = vmand %vm303_vm2, %vm1605_vm7  ;;  %vm1367_vm2 = vmmov 1  }
  0x7e   : > { %v473_v63 = vmul.f32 %v471_v58, %v1576_v4  ;;  %v1750_v2 = vrot.slane %v490_v60, %v1593_v18  ;;  %v1033_v5 = vsel %vm304_vm5, 1.0, %v1357_v0  ;;  %vm299_vm6 = vmand %vm1728_vm8, %vm1624_vm12 }
  0x7f   : > { %v1753_v3 = vrot.slane %v494_v61, %v1593_v18  ;;  %v556_v6 = vrot.slane %v1033_v5, %v1593_v18  ;;  %v560_v7 = vrot.slane %v1033_v5, %v1595_v19  ;;  %vm300_vm7 = vmand %vm299_vm6, %vm1628_vm13  ;;  %vm352_vm13 = vcmp.lt.s32.totalorder %v1795_v22, 16 }
  0x80   : > { %v475_v4 = vcombine.high %v473_v63, %v473_v63  ;;  %477 = vst [vmem:[#allocation2 + $0x20] sm:$0xf] %v473_v63  ;;  %v1032_v8 = vsel %vm300_vm7, 1.0, %v1357_v0  ;;  %vm307_vm10 = vmand %vm1728_vm8, %vm1652_vm1  ;;  %vm322_vm1 = vcmp.lt.s32.totalorder %v1795_v22, 17  ;;  %vm629_vm8 = vcmask 293888  }
  0x81   : > { %v1770_v9 = vrot.slane %v556_v6, %v1593_v18  ;;  %v1773_v10 = vrot.slane %v560_v7, %v1593_v18  ;;  %v526_v11 = vrot.slane %v1032_v8, %v1593_v18  ;;  %v530_v12 = vrot.slane %v1032_v8, %v1595_v19  ;;  %vm308_vm12 = vmand %vm307_vm10, %vm1671_vm9 }
  0x82   : > { %478 = vst [vmem:[#allocation2 + $0x28] sm:$0xf] %v475_v4  ;;  %v1034_v13 = vsel %vm308_vm12, 1.0, %v1357_v0  ;;  %vm388_vm9 = vcmp.lt.s32.totalorder %v1795_v22, 15  ;;  %vm1073_vm5 = vmpackc.low %vm633_vm0, %vm1367_vm2  ;;  %v797_v22 = vld [vmem:[%s1984_s3] sm:$0xff]  ;;  %vm818_vm6 = vcmask 621568  }
  0x83   : > { %v1781_v14 = vrot.slane %v526_v11, %v1593_v18  ;;  %v1784_v15 = vrot.slane %v530_v12, %v1593_v18  ;;  %v592_v16 = vrot.slane %v1034_v13, %v1593_v18  ;;  %v596_v17 = vrot.slane %v1034_v13, %v1595_v19 }
  0x85   : > { %v1789_v20 = vrot.slane %v592_v16, %v1593_v18  ;;  %v1792_v21 = vrot.slane %v596_v17, %v1593_v18 }
  0xe2   : > { %v1158_v0 = vpop.permute.xlu0 %1157  ;;  %v1168_v23 = vpop.permute.xlu1 %1167 }
  0xe3   : > { %v1160_v24 = vunpack.i.h.bf16 %v1158_v0  ;;  %v1159_v25 = vunpack.i.l.bf16 %v1158_v0  ;;  %v1170_v26 = vunpack.i.h.bf16 %v1168_v23  ;;  %v1169_v27 = vunpack.i.l.bf16 %v1168_v23 }
  0xe5   : > { %v353_v18 = vsel %vm352_vm13, %v1159_v25, %v1160_v24  ;;  %v354_v1 = vsel %vm352_vm13, %v1160_v24, %v1159_v25  ;;  %v323_v19 = vsel %vm322_vm1, %v1169_v27, %v1170_v26  ;;  %v324_v28 = vsel %vm322_vm1, %v1170_v26, %v1169_v27 }
  0xe6   : > { %v374_v29 = vmul.f32 %v1657_v36, %v354_v1  ;;  %v375_v30 = vmul.f32 %v1660_v37, %v353_v18  ;;  %v344_v31 = vmul.f32 %v1680_v42, %v324_v28  ;;  %v345_v32 = vmul.f32 %v1683_v43, %v323_v19  ;;  %v1163_v33 = vpop.permute.xlu0 %1162  ;;  %v1173_v34 = vpop.permute.xlu1 %1172 }
  0xe7   : > { %v1165_v35 = vunpack.i.h.bf16 %v1163_v33  ;;  %v1164_v38 = vunpack.i.l.bf16 %v1163_v33  ;;  %v1175_v39 = vunpack.i.h.bf16 %v1173_v34  ;;  %v1174_v40 = vunpack.i.l.bf16 %v1173_v34 }
  0xe8   : > { %v378_v41 = vrot.slane %v374_v29, 4  ;;  %v379_v44 = vrot.slane %v375_v30, 4  ;;  %346 = vst [vmem:[#allocation2] sm:$0xf] %v344_v31  ;;  %347 = vst [vmem:[#allocation2 + $0x8] sm:$0xf] %v345_v32 }
  0xe9   : > { %v419_v45 = vsel %vm418_vm3, %v1164_v38, %v1165_v35  ;;  %v420_v46 = vsel %vm418_vm3, %v1165_v35, %v1164_v38  ;;  %v389_v48 = vsel %vm388_vm9, %v1174_v40, %v1175_v39  ;;  %v390_v49 = vsel %vm388_vm9, %v1175_v39, %v1174_v40 }
  0xea   : > { %382 = vst [vmem:[#allocation2] sm:$0xf0] %v378_v41  ;;  %383 = vst [vmem:[#allocation2 + $0x8] sm:$0xf0] %v379_v44  ;;  %v440_v51 = vmul.f32 %v1695_v47, %v420_v46  ;;  %v441_v54 = vmul.f32 %v1702_v50, %v419_v45  ;;  %v410_v55 = vmul.f32 %v1735_v59, %v390_v49  ;;  %v1178_v57 = vpop.permute.xlu0 %1177  ;;  %v1183_v58 = vpop.permute.xlu1 %1182 }
  0xeb   : > { %v411_v56 = vmul.f32 %v1744_v62, %v389_v48  ;;  %v1180_v60 = vunpack.i.h.bf16 %v1178_v57  ;;  %v1179_v61 = vunpack.i.l.bf16 %v1178_v57  ;;  %v1185_v63 = vunpack.i.h.bf16 %v1183_v58 }
  0xec   : > { %v1184_v5 = vunpack.i.l.bf16 %v1183_v58  ;;  %v444_v6 = vrot.slane %v440_v51, 4  ;;  %v445_v7 = vrot.slane %v441_v54, 4  ;;  %412 = vst [vmem:[#allocation2 + $0x10] sm:$0xf] %v410_v55 }
  0xed   : > { %413 = vst [vmem:[#allocation2 + $0x18] sm:$0xf] %v411_v56  ;;  %v484_v4 = vsel %vm483_vm11, %v1179_v61, %v1180_v60  ;;  %v485_v8 = vsel %vm483_vm11, %v1180_v60, %v1179_v61  ;;  %v618_v61 = vld [vmem:[#allocation9] sm:$0xff] }
  0xee   : > { %v550_v11 = vsel %vm549_vm14, %v1184_v5, %v1185_v63  ;;  %v551_v12 = vsel %vm549_vm14, %v1185_v63, %v1184_v5  ;;  %448 = vst [vmem:[#allocation2 + $0x10] sm:$0xf0] %v444_v6  ;;  %449 = vst [vmem:[#allocation2 + $0x18] sm:$0xf0] %v445_v7  ;;  %v505_v13 = vmul.f32 %v1750_v2, %v484_v4  ;;  %v1188_v23 = vpop.permute.xlu0 %1187  ;;  %v1193_v24 = vpop.permute.xlu1 %1192 }
  0xef   : > { %v506_v16 = vmul.f32 %v1753_v3, %v485_v8  ;;  %v571_v17 = vmul.f32 %v1770_v9, %v550_v11  ;;  %v572_v0 = vmul.f32 %v1773_v10, %v551_v12  ;;  %v1190_v25 = vunpack.i.h.bf16 %v1188_v23  ;;  %v611_v11 = vld [vmem:[%s1563_s9] sm:$0xf] }
  0xf0   : > { %v1189_v26 = vunpack.i.l.bf16 %v1188_v23  ;;  %v1195_v27 = vunpack.i.h.bf16 %v1193_v24  ;;  %v1194_v18 = vunpack.i.l.bf16 %v1193_v24  ;;  %v509_v1 = vrot.slane %v505_v13, 4 }
  0xf1   : > { %v510_v19 = vrot.slane %v506_v16, 4  ;;  %v575_v28 = vrot.slane %v571_v17, 4  ;;  %v576_v29 = vrot.slane %v572_v0, 4  ;;  %v620_v40 = vld [vmem:[#allocation2 + $0x8] sm:$0xff]  ;;  %v619_v44 = vld [vmem:[#allocation2] sm:$0xff]  ;;  %v612_v12 = vunpack.c.l.bf16 %v611_v11 }
  0xf2   : > { %v520_v30 = vsel %vm519_vm15, %v1189_v26, %v1190_v25  ;;  %v521_v31 = vsel %vm519_vm15, %v1190_v25, %v1189_v26  ;;  %v586_v32 = vsel %vm585_vm4, %v1194_v18, %v1195_v27  ;;  %v587_v33 = vsel %vm585_vm4, %v1195_v27, %v1194_v18  ;;  %513 = vst [vmem:[#allocation2 + $0x20] sm:$0xf0] %v509_v1 }
  0xf3   : > { %514 = vst [vmem:[#allocation2 + $0x28] sm:$0xf0] %v510_v19  ;;  %579 = vst [vmem:[#allocation2 + $0x30] sm:$0xf0] %v575_v28  ;;  %v541_v34 = vmul.f32 %v1781_v14, %v520_v30  ;;  %v542_v35 = vmul.f32 %v1784_v15, %v521_v31  ;;  %v607_v38 = vmul.f32 %v1789_v20, %v586_v32 }
  0xf4   : > { %580 = vst [vmem:[#allocation2 + $0x38] sm:$0xf0] %v576_v29  ;;  %v608_v39 = vmul.f32 %v1792_v21, %v587_v33  ;;  %v614_v13 = vcombine.high %v612_v12, %v612_v12  ;;  %616 = vst [vmem:[#allocation3 + $0x90] sm:$0xf] %v612_v12 }
  0xf5   : > { %543 = vst [vmem:[#allocation2 + $0x30] sm:$0xf] %v541_v34  ;;  %544 = vst [vmem:[#allocation2 + $0x38] sm:$0xf] %v542_v35  ;;  %v622_v41 = vld [vmem:[#allocation2 + $0x18] sm:$0xff]  ;;  %v621_v45 = vld [vmem:[#allocation2 + $0x10] sm:$0xff] }
  0xf6   : > { %609 = vst [vmem:[#allocation2 + $0x40] sm:$0xf] %v607_v38  ;;  %610 = vst [vmem:[#allocation2 + $0x48] sm:$0xf] %v608_v39  ;;  %v1048_v46 = vpack.c.bf16 %v622_v41, %v620_v40  ;;  %v1050_v48 = vpack.c.bf16 %v621_v45, %v619_v44 }
  0xf7   : > { %617 = vst [vmem:[#allocation3 + $0x98] sm:$0xf] %v614_v13 }
  0xf8   : > { %1049 = vmatprep.subr.bf16.mxu0 %v1048_v46 }
  0xf9   : > { %1051 = vmatpush1.bf16.msra.mxu0 %v1050_v48  ;;  %v623_v54 = vld [vmem:[#allocation2 + $0x20] sm:$0xff] }
  0xfa   : > { %v624_v49 = vld [vmem:[#allocation2 + $0x28] sm:$0xff] }
  0xfc   : > { %v626_v51 = vld [vmem:[#allocation2 + $0x38] sm:$0xff]  ;;  %v625_v55 = vld [vmem:[#allocation2 + $0x30] sm:$0xff] }
  0xfd   : > { %v1052_v56 = vpack.c.bf16 %v626_v51, %v624_v49  ;;  %v1054_v57 = vpack.c.bf16 %v625_v55, %v623_v54  ;;  %v628_v58 = vld [vmem:[#allocation2 + $0x48] sm:$0xf]  ;;  %v627_v60 = vld [vmem:[#allocation2 + $0x40] sm:$0xf] }
  0xff   : > { %1053 = vmatprep.subr.bf16.mxu0 %v1052_v56 }
 0x100   : > { %1055 = vmatpush1.bf16.msra.mxu0 %v1054_v57 }
 0x101   : > { %1035 = vmatprep.subr.msk.mxu0 %vm633_vm0, %v628_v58 }
 0x104   : > { %1036 = vmatpush1.msk.msra.mxu0 %vm633_vm0, %v627_v60 }
 0x105   : > { %1037 = vmatmul.mubr.msk.f32.vlgmr.msra.gmra.mrb[0].mxu0 %vm629_vm8, %v618_v61 }
 0x1d8   : > { %v706_v63 = vpop.f32.mrb[0].mxu0 }
 0x1d9   : > { %v711_v5 = vmax.f32 %v706_v63, 0.0  ;;  %v708_v6 = vpop.f32.mrb[1].mxu0 }
 0x1da   : > { %v712_v7 = vmax.f32 %v708_v6, 0.0 }
 0x1db   : > { %713 = vrot.lane.b32.xlu0 %v711_v5, %s1360_s23  ;;  %v1857_v4 = vmul.f32 %v711_v5, %v1714_v52 }
 0x1dc   : > { %715 = vrot.lane.b32.xlu1 %v712_v7, %s1360_s23  ;;  %v1861_v8 = vmul.f32 %v712_v7, %v1717_v53  ;;  %s904_s23 = scalar_lea.sflag [#allocation6], %s1559_s30 }
 0x1df   : > { %723 = vrot.lane.b32.xlu0 %v711_v5, %s1359_s21 }
 0x1e0   : > { %725 = vrot.lane.b32.xlu1 %v712_v7, %s1359_s21  ;;  %s1937_s21 = scalar_lea.hbm %s1985_s4, %s1047_s24 }
 0x1e3   : > { %733 = vrot.lane.b32.xlu0 %v711_v5, %s1362_s5 }
 0x1e4   : > { %735 = vrot.lane.b32.xlu1 %v712_v7, %s1362_s5 }
 0x1e7   : > { %743 = vrot.lane.b32.xlu0 %v711_v5, %s1361_s27 }
 0x1e8   : > { %745 = vrot.lane.b32.xlu1 %v712_v7, %s1361_s27  ;;  %s1368_s27 = smov [#allocation10]  }
 0x1e9   : > { %s1286_s5 = sshll.u32 %s1368_s27, 4  ;;  %s1287_s5 = int_to_ptr.vmem [resolvable:$false] %s1286_s5 }
 0x1ea   : > { %p1289_p8 = scmp.lt.s32.totalorder %s1939_s8, %s1287_s5 }
 0x1eb   : > { %757 = vrot.lane.b32.xlu0 %v711_v5, %s1363_s6 }
 0x1ec   : > { %759 = vrot.lane.b32.xlu1 %v712_v7, %s1363_s6  ;;  %s1288_s6 = scalar_lea.vmem %s1287_s5, 512 }
 0x1ed   : > { %p1290_p12 = scmp.lt.s32.totalorder %s1288_s6, %s1282_s19 }
 0x1ef   : > { %767 = vrot.lane.b32.xlu0 %v711_v5, %s1365_s10  ;;  %p1291_p3 = por %p1290_p12, %p1289_p8 }
 0x1f0   : > { %769 = vrot.lane.b32.xlu1 %v712_v7, %s1365_s10 }
 0x1f1   : > { %p1292_p7 = pnand %p1291_p3, %p1285_p4 }
 0x1f3   : > { %777 = vrot.lane.b32.xlu0 %v711_v5, %s1364_s7 }
 0x1f4   : > { %779 = vrot.lane.b32.xlu1 %v712_v7, %s1364_s7 }
 0x1f7   : > { %787 = vrot.lane.b32.xlu0 %v711_v5, %s1366_s11 }
 0x1f8   : > { %789 = vrot.lane.b32.xlu1 %v712_v7, %s1366_s11 }
 0x24d   : > { %v714_v52 = vpop.permute.xlu0 %713 }
 0x24e   : > { %v716_v53 = vpop.permute.xlu1 %715 }
 0x24f   : > { %v717_v16 = vsel %vm322_vm1, %v714_v52, %v716_v53  ;;  %v718_v17 = vsel %vm322_vm1, %v716_v53, %v714_v52 }
 0x250   : > { %v719_v0 = vmul.f32 %v718_v17, %v1680_v42  ;;  %v720_v23 = vmul.f32 %v717_v16, %v1683_v43 }
 0x251   : > { %v724_v24 = vpop.permute.xlu0 %723 }
 0x252   : > { %v726_v25 = vpop.permute.xlu1 %725 }
 0x253   : > { %v727_v26 = vsel %vm352_vm13, %v724_v24, %v726_v25  ;;  %v728_v27 = vsel %vm352_vm13, %v726_v25, %v724_v24 }
 0x254   : > { %v729_v18 = vmul.f32 %v728_v27, %v1657_v36  ;;  %v730_v1 = vmul.f32 %v727_v26, %v1660_v37 }
 0x255   : > { %v734_v19 = vpop.permute.xlu0 %733 }
 0x256   : > { %v736_v28 = vpop.permute.xlu1 %735  ;;  %v1056_v29 = vpack.c.bf16 %v730_v1, %v720_v23  ;;  %v1058_v30 = vpack.c.bf16 %v729_v18, %v719_v0 }
 0x257   : > { %v737_v42 = vsel %vm388_vm9, %v734_v19, %v736_v28  ;;  %v738_v43 = vsel %vm388_vm9, %v736_v28, %v734_v19 }
 0x258   : > { %v739_v31 = vmul.f32 %v738_v43, %v1735_v59  ;;  %v740_v32 = vmul.f32 %v737_v42, %v1744_v62  ;;  %1057 = vmatprep.subr.bf16.mxu1 %v1056_v29 }
 0x259   : > { %v744_v33 = vpop.permute.xlu0 %743  ;;  %1059 = vmatpush1.bf16.msra.mxu1 %v1058_v30 }
 0x25a   : > { %v746_v36 = vpop.permute.xlu1 %745 }
 0x25b   : > { %v747_v37 = vsel %vm418_vm3, %v744_v33, %v746_v36  ;;  %v748_v34 = vsel %vm418_vm3, %v746_v36, %v744_v33 }
 0x25c   : > { %v749_v35 = vmul.f32 %v748_v34, %v1695_v47  ;;  %v750_v38 = vmul.f32 %v747_v37, %v1702_v50 }
 0x25d   : > { %v758_v39 = vpop.permute.xlu0 %757 }
 0x25e   : > { %v760_v40 = vpop.permute.xlu1 %759  ;;  %v1060_v41 = vpack.c.bf16 %v750_v38, %v740_v32  ;;  %v1062_v59 = vpack.c.bf16 %v749_v35, %v739_v31 }
 0x25f   : > { %v761_v62 = vsel %vm483_vm11, %v758_v39, %v760_v40  ;;  %v762_v44 = vsel %vm483_vm11, %v760_v40, %v758_v39 }
 0x260   : > { %v763_v45 = vmul.f32 %v761_v62, %v1750_v2  ;;  %v764_v46 = vmul.f32 %v762_v44, %v1753_v3  ;;  %1061 = vmatprep.subr.bf16.mxu1 %v1060_v41 }
 0x261   : > { %v768_v48 = vpop.permute.xlu0 %767  ;;  %1063 = vmatpush1.bf16.msra.mxu1 %v1062_v59 }
 0x262   : > { %v770_v47 = vpop.permute.xlu1 %769  ;;  %v1064_v50 = vpack.c.bf16 %v764_v46, %v1861_v8  ;;  %v1066_v49 = vpack.c.bf16 %v763_v45, %v1857_v4  ;;  %v817_v4 = vld [vmem:[#allocation3 + $0x98] sm:$0xf]  ;;  %v816_v8 = vld [vmem:[#allocation3 + $0x90] sm:$0xf] }
 0x263   : > { %v771_v51 = vsel %vm519_vm15, %v768_v48, %v770_v47  ;;  %v772_v54 = vsel %vm519_vm15, %v770_v47, %v768_v48 }
 0x264   : > { %v773_v55 = vmul.f32 %v771_v51, %v1781_v14  ;;  %v774_v2 = vmul.f32 %v772_v54, %v1784_v15  ;;  %1065 = vmatprep.subr.bf16.mxu1 %v1064_v50 }
 0x265   : > { %v778_v3 = vpop.permute.xlu0 %777  ;;  %1067 = vmatpush1.bf16.msra.mxu1 %v1066_v49 }
 0x266   : > { %v780_v56 = vpop.permute.xlu1 %779 }
 0x267   : > { %v781_v57 = vsel %vm549_vm14, %v778_v3, %v780_v56  ;;  %v782_v58 = vsel %vm549_vm14, %v780_v56, %v778_v3 }
 0x268   : > { %v783_v60 = vmul.f32 %v781_v57, %v1770_v9  ;;  %v784_v61 = vmul.f32 %v782_v58, %v1773_v10 }
 0x269   : > { %v788_v63 = vpop.permute.xlu0 %787 }
 0x26a   : > { %v790_v5 = vpop.permute.xlu1 %789  ;;  %v1068_v6 = vpack.c.bf16 %v784_v61, %v774_v2  ;;  %v1070_v14 = vpack.c.bf16 %v783_v60, %v773_v55 }
 0x26b   : > { %v791_v15 = vsel %vm585_vm4, %v788_v63, %v790_v5  ;;  %v792_v7 = vsel %vm585_vm4, %v790_v5, %v788_v63 }
 0x26c   : > { %v793_v11 = vmul.f32 %v791_v15, %v1789_v20  ;;  %v794_v9 = vmul.f32 %v792_v7, %v1792_v21  ;;  %1069 = vmatprep.subr.bf16.mxu1 %v1068_v6 }
 0x26d   : > { %1071 = vmatpush1.bf16.msra.mxu1 %v1070_v14 }
 0x26e   : > { %v1072_v10 = vpack.c.bf16 %v817_v4, %v794_v9  ;;  %v1075_v12 = vpack.c.bf16 %v816_v8, %v793_v11 }
 0x270   : > { %1074 = vmatprep.subr.msk.bf16.mxu1 %vm1073_vm5, %v1072_v10 }
 0x271   : > { %1077 = vmatpush1.bf16.msk.msra.mxu1 %vm1073_vm5, %v1075_v12 }
 0x274   : > { %1040 = vmatmul.mubr.msk.f32.vlgmr.msra.gmra.mrb[0].mxu1 %vm818_vm6, %v797_v22 }
 0x347   : > { %v894_v20 = vpop.f32.mrb[0].mxu1 }
 0x348   : > { %v899_v21 = vmax.f32 %v894_v20, 0.0  ;;  %v896_v13 = vpop.f32.mrb[1].mxu1 }
 0x349   : > { %v900_v52 = vmax.f32 %v896_v13, 0.0 }
 0x34a   : > { %901 = vst [vmem:[%s238_s26] sm:$0xff] %v899_v21 }
 0x34b   : > { %902 = vst [vmem:[%s238_s26 + $0x8] sm:$0xff] %v900_v52 }
 0x34c   : > { %1295 = shalt.err (!%p1292_p7)
}
 0x34d   : > { %s1296_s30 = scalar_lea.hbm %s1937_s21, 256  ;;  %s1300_s11 = scalar_lea.hbm %s1985_s4, 512 }
 0x34e   : > { %p1297_p10 = scmp.ne.s32.totalorder %s1937_s21, %s1296_s30  ;;  %p1301_p0 = scmp.lt.u32.totalorder %s1937_s21, %s1985_s4 }
 0x34f   : > { %p1302_p11 = scmp.lt.u32.totalorder %s1300_s11, %s1296_s30  ;;  %p1304_p2 = scmp.lt.u32.totalorder %s1296_s30, %s1937_s21 }
 0x350   : > { %p1298_p13 = pnand %p1297_p10, %p1513_p6 }
 0x351   : > { %p1303_p9 = por %p1302_p11, %p1301_p0 }
 0x352   : > { %p1299_p5 = pneg %p1298_p13 }
 0x353   : > { %p1305_p1 = por %p1304_p2, %p1303_p9 }
 0x355   : > { %p1306_p4 = pnand %p1305_p1, %p1299_p5 }
 0x357   : > { %1309 = shalt.err (!%p1306_p4)
}
 0x358   : > { %1088 = dma.vmem_to_hbm [thread:$0]  (%p1513_p6), %s1939_s8, 256, %s1937_s21, %s904_s23  }
 0x359 PF: > { %s930_s20 = sand.u32 1, %s1340_s15   ;;  %p2018_p8 = scmp.ne.s32.totalorder %s1990_s22, 0 }
 0x35a   : > { %p2019_p12 = scmp.ge.s32.totalorder %s1352_s18, 2  ;;  %s931_s24 = scalar_lea.sflag [#allocation6], %s930_s20 }
 0x35c   : > { %p1102_p3 = pnand %p2019_p12, %p2018_p8 }
 0x35e   : > { %1335 = dma.done.wait (!%p1102_p3), %s931_s24, 256  }
 0x35f   : > { %1337 = vsyncadd (!%p1102_p3), %s931_s24, 4294967040  ;;  %p18_p7 = scmp.ge.s32.totalorder %s1450_s29, 4   ;;  %s2020_s15 = smov %s1344_s16 }
 0x360   : > { %s2021_s16 = smov %s1348_s17  ;;  %s2022_s17 = smov %s1509_s28 }
 0x361   : > { %s2023_s18 = smov %s1450_s29  ;;  %20 = sbr.rel (!%p18_p7) target bundleno = 6 (0x6), region = 89 }
 0x368   :  { %936 = vsyncpa [#allocation5], 1 }
 0x369   :  { %938 = vsyncpa [#allocation5 + $0x1], 1 }
 0x36a   :  { %939 = vsyncpa [#allocation8], 1 }
 0x36b   :  { %940 = vsyncpa [#allocation6], 1 }
 0x36c   :  { %942 = vsyncpa [#allocation6 + $0x1], 1 }

</bundles_post_ra>
